<compile_context>
chip_gen: v7x
topology: tpu7x:2x2x1
jax: 0.10.0
libtpu: 0.0.40
codegen_flags: <defaults>
</compile_context>

<pallas_src>
import math

import jax
import jax.numpy as jnp
from jax.experimental import pallas as pl
from jax.experimental.pallas import tpu as pltpu


# ----------------------------------------------------------------------------
# helpers
# ----------------------------------------------------------------------------
def _full_spec(shape):
    n = len(shape)
    return pl.BlockSpec(tuple(shape), lambda *_: (0,) * n)


def _softmax_last(s):
    m = jnp.max(s, axis=-1, keepdims=True)
    e = jnp.exp(s - m)
    return e / jnp.sum(e, axis=-1, keepdims=True)


# ----------------------------------------------------------------------------
# bidirectional GRU kernel
#   grid over time chunks; fwd/bwd fused along the row axis; only h @ Whh
#   runs inside the recurrence (input projections hoisted to the wrapper).
# ----------------------------------------------------------------------------
def _bigru_kernel(gx_ref, whh_f_ref, whh_b_ref, bhh_ref,
                  outf_ref, outb_ref, h_ref):
    @pl.when(pl.program_id(0) == 0)
    def _():
        h_ref[...] = jnp.zeros_like(h_ref)

    Tc, B2, H3 = gx_ref.shape
    B = B2 // 2
    H = H3 // 3
    whh_f = whh_f_ref[...]
    whh_b = whh_b_ref[...]
    bhh = bhh_ref[...]

    # static unroll over the (small) time chunk
    for i in range(Tc):
        gx = gx_ref[i]                      # (2B, 3H)
        h = h_ref[...]                      # (2B, H)
        gh = jnp.concatenate(
            [jnp.dot(h[:B], whh_f, preferred_element_type=jnp.float32),
             jnp.dot(h[B:], whh_b, preferred_element_type=jnp.float32)],
            axis=0) + bhh                   # (2B, 3H)
        r = jax.nn.sigmoid(gx[:, 0:H] + gh[:, 0:H])
        z = jax.nn.sigmoid(gx[:, H:2 * H] + gh[:, H:2 * H])
        n = jnp.tanh(gx[:, 2 * H:] + r * gh[:, 2 * H:])
        h_new = (1.0 - z) * n + z * h
        h_ref[...] = h_new
        outf_ref[i] = h_new[:B]             # lane-dense (B, H) store
        outb_ref[i] = h_new[B:]


def bigru(x, p, max_time_chunk=16):
    """x: (B, T, Din) -> (B, T, 2H), PyTorch bidirectional GRU semantics."""
    B, T, Din = x.shape
    H = p['whh_f'].shape[0]
    Tc = math.gcd(T, max_time_chunk)

    # Hoisted input projections: one big f32 matmul per direction, time-major.
    gx_f = jnp.einsum('btd,dh->tbh', x, p['wih_f'],
                      preferred_element_type=jnp.float32) + p['bih_f'][None]
    gx_b = jnp.einsum('btd,dh->tbh', x, p['wih_b'],
                      preferred_element_type=jnp.float32) + p['bih_b'][None]
    # Stack forward + time-reversed backward gates along the row axis so the
    # recurrence does the gate math once over (2B, 3H).
    gx = jnp.concatenate([gx_f, jnp.flip(gx_b, axis=0)], axis=1)  # (T, 2B, 3H)
    bhh = jnp.concatenate([jnp.broadcast_to(p['bhh_f'], (B, 3 * H)),
                           jnp.broadcast_to(p['bhh_b'], (B, 3 * H))], axis=0)

    outf, outb = pl.pallas_call(
        _bigru_kernel,
        grid=(T // Tc,),
        in_specs=[pl.BlockSpec((Tc, 2 * B, 3 * H), lambda c: (c, 0, 0)),
                  _full_spec(p['whh_f'].shape),
                  _full_spec(p['whh_b'].shape),
                  _full_spec((2 * B, 3 * H))],
        out_specs=[pl.BlockSpec((Tc, B, H), lambda c: (c, 0, 0)),
                   pl.BlockSpec((Tc, B, H), lambda c: (c, 0, 0))],
        out_shape=[jax.ShapeDtypeStruct((T, B, H), jnp.float32),
                   jax.ShapeDtypeStruct((T, B, H), jnp.float32)],
        scratch_shapes=[pltpu.VMEM((2 * B, H), jnp.float32)],
        compiler_params=pltpu.CompilerParams(
            dimension_semantics=("arbitrary",)),
    )(gx, p['whh_f'], p['whh_b'], bhh)

    h_f = jnp.transpose(outf, (1, 0, 2))                    # (B, T, H)
    h_b = jnp.transpose(jnp.flip(outb, axis=0), (1, 0, 2))  # (B, T, H)
    return jnp.concatenate([h_f, h_b], axis=-1)             # (B, T, 2H)


# ----------------------------------------------------------------------------
# answer attention pooling: single invocation over all N = B*3 rows (VPU only)
# ----------------------------------------------------------------------------
def _ans_attn_kernel(aenc_ref, watt_ref, out_ref):
    a = aenc_ref[...]                                     # (N, A, D)
    w = watt_ref[...][:, 0]                               # (D,)
    s = jnp.sum(a * w[None, None, :], axis=-1)            # (N, A)
    prob = _softmax_last(s)                               # softmax over A
    out_ref[...] = jnp.sum(prob[:, :, None] * a, axis=1)  # (N, D)


def answer_attention(a_enc, w_att):
    N, A, D = a_enc.shape
    return pl.pallas_call(
        _ans_attn_kernel,
        grid=(1,),
        in_specs=[_full_spec((N, A, D)), _full_spec(w_att.shape)],
        out_specs=_full_spec((N, D)),
        out_shape=jax.ShapeDtypeStruct((N, D), jnp.float32),
    )(a_enc, w_att)


# ----------------------------------------------------------------------------
# multi-way attention kernel (grid over batch; projections hoisted to wrapper)
# ----------------------------------------------------------------------------
def _mwan_attn_kernel(hq_ref, hp_ref, s1c_ref, s2c_ref, s1b_ref, s1m_ref,
                      s2m_ref, vc_ref, wd_ref, vd_ref, wm_unused_ref,
                      vm_ref, ws_ref, vs_ref, out_ref):
    hq = hq_ref[0]   # (P, 2E)   passage encoded by q_encoder (as in reference)
    hp = hp_ref[0]   # (Q, 2E)   query encoded by p_encoder
    P, E2 = hq.shape
    Q = hp.shape[0]

    vc = vc_ref[...][:, 0]
    vd = vd_ref[...][:, 0]
    vm = vm_ref[...][:, 0]
    vs = vs_ref[...][:, 0]

    def attend(scores, values):
        # softmax over last axis, then (Q, N) @ (N, 2E)
        return jnp.dot(_softmax_last(scores), values,
                       preferred_element_type=jnp.float32)

    # --- concat attention (projections hoisted) ---
    sjt = jnp.sum(jnp.tanh(s2c_ref[0][:, None, :] + s1c_ref[0][None, :, :])
                  * vc[None, None, :], axis=-1)                            # (Q, P)
    qtc = attend(sjt, hq)

    # --- bilinear attention (hq @ Wb hoisted) ---
    sjt = jax.lax.dot_general(hp, s1b_ref[0], (((1,), (1,)), ((), ())),
                              preferred_element_type=jnp.float32)          # (Q, P)
    qtb = attend(sjt, hq)

    # --- dot (element-product) attention (cannot be factored) ---
    prod = hq[None, :, :] * hp[:, None, :]                                 # (Q, P, 2E)
    h = jnp.tanh(jnp.dot(prod.reshape(Q * P, E2), wd_ref[...],
                         preferred_element_type=jnp.float32)).reshape(Q, P, -1)
    sjt = jnp.sum(h * vd[None, None, :], axis=-1)
    qtd = attend(sjt, hq)

    # --- minus attention, factored through the matmul (projections hoisted) ---
    sjt = jnp.sum(jnp.tanh(s1m_ref[0][None, :, :] - s2m_ref[0][:, None, :])
                  * vm[None, None, :], axis=-1)                            # (Q, P)
    qtm = attend(sjt, hq)

    # --- self attention on hp (cannot be factored) ---
    prods = hp[None, :, :] * hp[:, None, :]                                # (Q, Q, 2E)
    hs = jnp.tanh(jnp.dot(prods.reshape(Q * Q, E2), ws_ref[...],
                          preferred_element_type=jnp.float32)).reshape(Q, Q, -1)
    sjt = jnp.sum(hs * vs[None, None, :], axis=-1)
    qts = attend(sjt, hp)

    # single lane-dense store of the 6*E2-wide concatenation
    out_ref[0] = jnp.concatenate([hp, qts, qtc, qtd, qtb, qtm], axis=-1)


def mwan_attention(hq, hp, p):
    B, P, E2 = hq.shape
    Q = hp.shape[1]
    E = p['Wc1'].shape[1]

    # Hoisted batched projections (full-batch f32 XLA matmuls, MXU-friendly).
    s1c = jnp.einsum('bpe,ek->bpk', hq, p['Wc1'], preferred_element_type=jnp.float32)
    s2c = jnp.einsum('bqe,ek->bqk', hp, p['Wc2'], preferred_element_type=jnp.float32)
    s1b = jnp.einsum('bpe,ef->bpf', hq, p['Wb'], preferred_element_type=jnp.float32)
    s1m = jnp.einsum('bpe,ek->bpk', hq, p['Wm'], preferred_element_type=jnp.float32)
    s2m = jnp.einsum('bqe,ek->bqk', hp, p['Wm'], preferred_element_type=jnp.float32)

    per_batch_shapes = [(1, P, E2), (1, Q, E2), (1, P, E), (1, Q, E),
                        (1, P, E2), (1, P, E), (1, Q, E)]
    weights = (p['vc'], p['Wd'], p['vd'], p['Wm'], p['vm'], p['Ws'], p['vs'])
    in_specs = ([pl.BlockSpec(s, lambda b: (b, 0, 0)) for s in per_batch_shapes]
                + [_full_spec(w.shape) for w in weights])
    return pl.pallas_call(
        _mwan_attn_kernel,
        grid=(B,),
        in_specs=in_specs,
        out_specs=pl.BlockSpec((1, Q, 6 * E2), lambda b: (b, 0, 0)),
        out_shape=jax.ShapeDtypeStruct((B, Q, 6 * E2), jnp.float32),
        compiler_params=pltpu.CompilerParams(
            dimension_semantics=("parallel",)),
    )(hq, hp, s1c, s2c, s1b, s1m, s2m, *weights)


# ----------------------------------------------------------------------------
# prediction layer: single invocation over the whole batch
# ----------------------------------------------------------------------------
def _predict_kernel(hq_ref, agg_ref, sqp_ref, sp1_ref, avec_ref,
                    vq_ref, wp2_ref, vp_ref, wpred_ref, score_ref):
    hq = hq_ref[...]            # (B, P, 2E)
    agg = agg_ref[...]          # (B, Q, 2E)
    avec = avec_ref[...]        # (B, 3, emb)
    vq = vq_ref[...][:, 0]      # (E,)
    vp = vp_ref[...][:, 0]      # (E,)

    # rq = attention pooling over hq (Wq(hq) hoisted to the wrapper)
    sq = jnp.sum(jnp.tanh(sqp_ref[...]) * vq[None, None, :], axis=-1)   # (B, P)
    aq = _softmax_last(sq)
    rq = jnp.sum(aq[:, :, None] * hq, axis=1)                           # (B, 2E)

    # rp = attention pooling over the aggregation representation
    sp2 = jnp.dot(rq, wp2_ref[...], preferred_element_type=jnp.float32)  # (B, E)
    sp = jnp.sum((sp1_ref[...] + sp2[:, None, :]) * vp[None, None, :], axis=-1)
    ap = _softmax_last(sp)
    rp = jnp.sum(ap[:, :, None] * agg, axis=1)                          # (B, 2E)

    enc = jnp.dot(rp, wpred_ref[...], preferred_element_type=jnp.float32)
    enc = jnp.where(enc >= 0.0, enc, 0.01 * enc)                        # F.leaky_relu
    # TODO(synk): F.dropout omitted (deterministic forward / eval mode).

    logits = jnp.sum(avec * enc[:, None, :], axis=-1)                   # (B, 3)
    score_ref[...] = _softmax_last(logits)


def predict(hq, agg, a_vec, p):
    B = hq.shape[0]
    sq_proj = jnp.einsum('bpe,ek->bpk', hq, p['Wq'], preferred_element_type=jnp.float32)
    sp1 = jnp.einsum('bqe,ek->bqk', agg, p['Wp1'], preferred_element_type=jnp.float32)
    args = (hq, agg, sq_proj, sp1, a_vec,
            p['vq'], p['Wp2'], p['vp'], p['prediction'])
    return pl.pallas_call(
        _predict_kernel,
        grid=(1,),
        in_specs=[_full_spec(a.shape) for a in args],
        out_specs=_full_spec((B, 3)),
        out_shape=jax.ShapeDtypeStruct((B, 3), jnp.float32),
    )(*args)


# ----------------------------------------------------------------------------
# parameter initialization (deterministic, synthetic)
# ----------------------------------------------------------------------------
def init_params(key, vocab_size, embedding_size, encoder_size):
    D, E = embedding_size, encoder_size
    keys = iter(jax.random.split(key, 64))

    def uni(shape, scale):
        return jax.random.uniform(next(keys), shape, jnp.float32, -scale, scale)

    def xavier(shape):  # shape = (in, out), gain 0.1 like the reference init
        bound = 0.1 * (6.0 / (shape[0] + shape[1])) ** 0.5
        return uni(shape, bound)

    def gru_params(din, h):
        s = 1.0 / float(h) ** 0.5
        return {
            'wih_f': uni((din, 3 * h), s), 'whh_f': uni((h, 3 * h), s),
            'bih_f': uni((1, 3 * h), s),   'bhh_f': uni((1, 3 * h), s),
            'wih_b': uni((din, 3 * h), s), 'whh_b': uni((h, 3 * h), s),
            'bih_b': uni((1, 3 * h), s),   'bhh_b': uni((1, 3 * h), s),
        }

    return {
        'embedding': uni((vocab_size + 1, D), 0.1),
        'a_encoder': gru_params(D, D // 2),
        'q_encoder': gru_params(D, E),
        'p_encoder': gru_params(D, E),
        'gru_agg': gru_params(12 * E, E),
        'a_attention': xavier((D, 1)),
        'Wc1': xavier((2 * E, E)), 'Wc2': xavier((2 * E, E)), 'vc': xavier((E, 1)),
        'Wb': xavier((2 * E, 2 * E)),
        'Wd': xavier((2 * E, E)), 'vd': xavier((E, 1)),
        'Wm': xavier((2 * E, E)), 'vm': xavier((E, 1)),
        'Ws': xavier((2 * E, E)), 'vs': xavier((E, 1)),
        'Wq': xavier((2 * E, E)), 'vq': xavier((E, 1)),
        'Wp1': xavier((2 * E, E)), 'Wp2': xavier((2 * E, E)), 'vp': xavier((E, 1)),
        'prediction': xavier((2 * E, D)),
    }


# ----------------------------------------------------------------------------
# full forward
# ----------------------------------------------------------------------------
def mwan_forward(params, query, passage, answer, is_train=False):
    emb = params['embedding']
    q_embedding = emb[query]      # (B, Q, D)
    p_embedding = emb[passage]    # (B, P, D)
    a_embeddings = emb[answer]    # (B, 3, A, D)
    B, na, A, D = a_embeddings.shape

    # answer encoder + attention pooling
    a_enc = bigru(a_embeddings.reshape(B * na, A, D), params['a_encoder'])
    a_vec = answer_attention(a_enc, params['a_attention']).reshape(B, na, -1)

    # NOTE: reference feeds the passage to q_encoder and the query to p_encoder.
    hq = bigru(p_embedding, params['q_encoder'])   # (B, P, 2E)
    hp = bigru(q_embedding, params['p_encoder'])   # (B, Q, 2E)
    # TODO(synk): F.dropout(hq/hp) omitted (deterministic forward).

    aggregation = mwan_attention(hq, hp, params)        # (B, Q, 12E)
    agg_rep = bigru(aggregation, params['gru_agg'])     # (B, Q, 2E)

    score = predict(hq, agg_rep, a_vec, params)         # (B, 3)
    if not is_train:
        return score
    return -jnp.mean(jnp.log(score[:, 0]))


if __name__ == "__main__":
    vocab_size, embedding_size, encoder_size = 50, 32, 32
    B, Q_len, P_len, A_len = 2, 8, 16, 8

    key = jax.random.PRNGKey(0)
    kp, kq, kpp, ka = jax.random.split(key, 4)
    params = init_params(kp, vocab_size, embedding_size, encoder_size)

    query = jax.random.randint(kq, (B, Q_len), 1, vocab_size + 1)
    passage = jax.random.randint(kpp, (B, P_len), 1, vocab_size + 1)
    answer = jax.random.randint(ka, (B, 3, A_len), 1, vocab_size + 1)

    score = mwan_forward(params, query, passage, answer, is_train=False)
    score = jax.block_until_ready(score)
    assert score.shape == (B, 3)
    assert bool(jnp.all(jnp.isfinite(score)))
    print("KERNEL_OK")
</pallas_src>

<mosaic_0001>
module attributes {stable_mosaic.version = 11 : i64} {
  func.func @_bigru_kernel(%arg0: i32, %arg1: memref<8x12x48xf32, #tpu.memory_space<vmem>>, %arg2: memref<16x48xf32, #tpu.memory_space<vmem>>, %arg3: memref<16x48xf32, #tpu.memory_space<vmem>>, %arg4: memref<12x48xf32, #tpu.memory_space<vmem>>, %arg5: memref<8x6x16xf32, #tpu.memory_space<vmem>>, %arg6: memref<8x6x16xf32, #tpu.memory_space<vmem>>, %arg7: memref<12x16xf32, #tpu.memory_space<vmem>>) attributes {dimension_semantics = [#tpu.dimension_semantics<arbitrary>], iteration_bounds = array<i64: 1>, scalar_prefetch = 0 : i64, scratch_operands = 1 : i64, tpu.core_type = #tpu.core_type<tc>, window_params = [{transform_indices = @transform_0, window_bounds = array<i64: 8, 12, 48>}, {pipeline_mode = #tpu.pipeline_mode<synchronous>, transform_indices = @transform_1, window_bounds = array<i64: 16, 48>}, {pipeline_mode = #tpu.pipeline_mode<synchronous>, transform_indices = @transform_2, window_bounds = array<i64: 16, 48>}, {pipeline_mode = #tpu.pipeline_mode<synchronous>, transform_indices = @transform_3, window_bounds = array<i64: 12, 48>}, {transform_indices = @transform_4, window_bounds = array<i64: 8, 6, 16>}, {transform_indices = @transform_5, window_bounds = array<i64: 8, 6, 16>}]} {
    %c0_i32 = arith.constant 0 : i32
    %0 = arith.cmpi eq, %arg0, %c0_i32 : i32
    %1 = arith.extui %0 : i1 to i32
    %c0_i32_0 = arith.constant 0 : i32
    %2 = arith.cmpi ne, %1, %c0_i32_0 : i32
    scf.if %2 {
      %cst_142 = arith.constant 0.000000e+00 : f32
      %358 = vector.broadcast %cst_142 : f32 to vector<12x16xf32>
      %c0_143 = arith.constant 0 : index
      %c0_144 = arith.constant 0 : index
      %359 = vector.load %arg7[%c0_143, %c0_144] : memref<12x16xf32, #tpu.memory_space<vmem>>, vector<12x16xf32>
      tpu.vector_store %arg7[%c0_143, %c0_144], %358 {strides = array<i32>} : memref<12x16xf32, #tpu.memory_space<vmem>>, vector<12x16xf32>,
    } else {
    }
    %c0 = arith.constant 0 : index
    %c0_1 = arith.constant 0 : index
    %3 = vector.load %arg2[%c0, %c0_1] : memref<16x48xf32, #tpu.memory_space<vmem>>, vector<16x48xf32>
    %c0_2 = arith.constant 0 : index
    %c0_3 = arith.constant 0 : index
    %4 = vector.load %arg3[%c0_2, %c0_3] : memref<16x48xf32, #tpu.memory_space<vmem>>, vector<16x48xf32>
    %c0_4 = arith.constant 0 : index
    %c0_5 = arith.constant 0 : index
    %5 = vector.load %arg4[%c0_4, %c0_5] : memref<12x48xf32, #tpu.memory_space<vmem>>, vector<12x48xf32>
    %c0_6 = arith.constant 0 : index
    %c0_7 = arith.constant 0 : index
    %c0_8 = arith.constant 0 : index
    %6 = vector.load %arg1[%c0_6, %c0_7, %c0_8] : memref<8x12x48xf32, #tpu.memory_space<vmem>>, vector<1x12x48xf32>
    %7 = vector.shape_cast %6 : vector<1x12x48xf32> to vector<12x48xf32>
    %c0_9 = arith.constant 0 : index
    %c0_10 = arith.constant 0 : index
    %8 = vector.load %arg7[%c0_9, %c0_10] : memref<12x16xf32, #tpu.memory_space<vmem>>, vector<12x16xf32>
    %9 = vector.extract_strided_slice %8 {offsets = [0, 0], sizes = [6, 16], strides = [1, 1]} : vector<12x16xf32> to vector<6x16xf32>
    %cst = arith.constant dense<0.000000e+00> : vector<6x48xf32>
    %10 = tpu.matmul %9, %3, %cst {dimension_numbers = #tpu.dot_dimension_numbers<[1], [0], [0], [1], [0, 0, 1, 1], [], []>} : vector<6x16xf32>, vector<16x48xf32>, vector<6x48xf32> -> vector<6x48xf32>
    %11 = vector.extract_strided_slice %8 {offsets = [6, 0], sizes = [6, 16], strides = [1, 1]} : vector<12x16xf32> to vector<6x16xf32>
    %cst_11 = arith.constant dense<0.000000e+00> : vector<6x48xf32>
    %12 = tpu.matmul %11, %4, %cst_11 {dimension_numbers = #tpu.dot_dimension_numbers<[1], [0], [0], [1], [0, 0, 1, 1], [], []>} : vector<6x16xf32>, vector<16x48xf32>, vector<6x48xf32> -> vector<6x48xf32>
    %13 = tpu.concatenate %10, %12 in 0 : vector<6x48xf32>, vector<6x48xf32> -> vector<12x48xf32>
    %14 = arith.addf %13, %5 : vector<12x48xf32>
    %15 = vector.extract_strided_slice %7 {offsets = [0, 0], sizes = [12, 16], strides = [1, 1]} : vector<12x48xf32> to vector<12x16xf32>
    %16 = vector.extract_strided_slice %14 {offsets = [0, 0], sizes = [12, 16], strides = [1, 1]} : vector<12x48xf32> to vector<12x16xf32>
    %17 = arith.addf %15, %16 : vector<12x16xf32>
    %18 = arith.negf %17 : vector<12x16xf32>
    %19 = math.exp %18 : vector<12x16xf32>
    %cst_12 = arith.constant 1.000000e+00 : f32
    %20 = vector.broadcast %cst_12 : f32 to vector<12x16xf32>
    %21 = arith.addf %20, %19 : vector<12x16xf32>
    %22 = arith.divf %20, %21 : vector<12x16xf32>
    %23 = vector.extract_strided_slice %7 {offsets = [0, 16], sizes = [12, 16], strides = [1, 1]} : vector<12x48xf32> to vector<12x16xf32>
    %24 = vector.extract_strided_slice %14 {offsets = [0, 16], sizes = [12, 16], strides = [1, 1]} : vector<12x48xf32> to vector<12x16xf32>
    %25 = arith.addf %23, %24 : vector<12x16xf32>
    %26 = arith.negf %25 : vector<12x16xf32>
    %27 = math.exp %26 : vector<12x16xf32>
    %cst_13 = arith.constant 1.000000e+00 : f32
    %28 = vector.broadcast %cst_13 : f32 to vector<12x16xf32>
    %29 = arith.addf %28, %27 : vector<12x16xf32>
    %30 = arith.divf %28, %29 : vector<12x16xf32>
    %31 = vector.extract_strided_slice %7 {offsets = [0, 32], sizes = [12, 16], strides = [1, 1]} : vector<12x48xf32> to vector<12x16xf32>
    %32 = vector.extract_strided_slice %14 {offsets = [0, 32], sizes = [12, 16], strides = [1, 1]} : vector<12x48xf32> to vector<12x16xf32>
    %33 = arith.mulf %22, %32 : vector<12x16xf32>
    %34 = arith.addf %31, %33 : vector<12x16xf32>
    %35 = math.tanh %34 : vector<12x16xf32>
    %cst_14 = arith.constant 1.000000e+00 : f32
    %36 = vector.broadcast %cst_14 : f32 to vector<12x16xf32>
    %37 = arith.subf %36, %30 : vector<12x16xf32>
    %38 = arith.mulf %37, %35 : vector<12x16xf32>
    %39 = arith.mulf %30, %8 : vector<12x16xf32>
    %40 = arith.addf %38, %39 : vector<12x16xf32>
    %c0_15 = arith.constant 0 : index
    %c0_16 = arith.constant 0 : index
    %41 = vector.load %arg7[%c0_15, %c0_16] : memref<12x16xf32, #tpu.memory_space<vmem>>, vector<12x16xf32>
    tpu.vector_store %arg7[%c0_15, %c0_16], %40 {strides = array<i32>} : memref<12x16xf32, #tpu.memory_space<vmem>>, vector<12x16xf32>,
    %42 = vector.extract_strided_slice %40 {offsets = [0, 0], sizes = [6, 16], strides = [1, 1]} : vector<12x16xf32> to vector<6x16xf32>
    %c0_17 = arith.constant 0 : index
    %c0_18 = arith.constant 0 : index
    %c0_19 = arith.constant 0 : index
    %43 = vector.load %arg5[%c0_17, %c0_18, %c0_19] : memref<8x6x16xf32, #tpu.memory_space<vmem>>, vector<1x6x16xf32>
    %44 = vector.shape_cast %43 : vector<1x6x16xf32> to vector<6x16xf32>
    %45 = vector.shape_cast %42 : vector<6x16xf32> to vector<1x6x16xf32>
    tpu.vector_store %arg5[%c0_17, %c0_18, %c0_19], %45 {strides = array<i32>} : memref<8x6x16xf32, #tpu.memory_space<vmem>>, vector<1x6x16xf32>,
    %46 = vector.extract_strided_slice %40 {offsets = [6, 0], sizes = [6, 16], strides = [1, 1]} : vector<12x16xf32> to vector<6x16xf32>
    %c0_20 = arith.constant 0 : index
    %c0_21 = arith.constant 0 : index
    %c0_22 = arith.constant 0 : index
    %47 = vector.load %arg6[%c0_20, %c0_21, %c0_22] : memref<8x6x16xf32, #tpu.memory_space<vmem>>, vector<1x6x16xf32>
    %48 = vector.shape_cast %47 : vector<1x6x16xf32> to vector<6x16xf32>
    %49 = vector.shape_cast %46 : vector<6x16xf32> to vector<1x6x16xf32>
    tpu.vector_store %arg6[%c0_20, %c0_21, %c0_22], %49 {strides = array<i32>} : memref<8x6x16xf32, #tpu.memory_space<vmem>>, vector<1x6x16xf32>,
    %c1 = arith.constant 1 : index
    %c0_23 = arith.constant 0 : index
    %c0_24 = arith.constant 0 : index
    %50 = vector.load %arg1[%c1, %c0_23, %c0_24] : memref<8x12x48xf32, #tpu.memory_space<vmem>>, vector<1x12x48xf32>
    %51 = vector.shape_cast %50 : vector<1x12x48xf32> to vector<12x48xf32>
    %c0_25 = arith.constant 0 : index
    %c0_26 = arith.constant 0 : index
    %52 = vector.load %arg7[%c0_25, %c0_26] : memref<12x16xf32, #tpu.memory_space<vmem>>, vector<12x16xf32>
    %53 = vector.extract_strided_slice %52 {offsets = [0, 0], sizes = [6, 16], strides = [1, 1]} : vector<12x16xf32> to vector<6x16xf32>
    %cst_27 = arith.constant dense<0.000000e+00> : vector<6x48xf32>
    %54 = tpu.matmul %53, %3, %cst_27 {dimension_numbers = #tpu.dot_dimension_numbers<[1], [0], [0], [1], [0, 0, 1, 1], [], []>} : vector<6x16xf32>, vector<16x48xf32>, vector<6x48xf32> -> vector<6x48xf32>
    %55 = vector.extract_strided_slice %52 {offsets = [6, 0], sizes = [6, 16], strides = [1, 1]} : vector<12x16xf32> to vector<6x16xf32>
    %cst_28 = arith.constant dense<0.000000e+00> : vector<6x48xf32>
    %56 = tpu.matmul %55, %4, %cst_28 {dimension_numbers = #tpu.dot_dimension_numbers<[1], [0], [0], [1], [0, 0, 1, 1], [], []>} : vector<6x16xf32>, vector<16x48xf32>, vector<6x48xf32> -> vector<6x48xf32>
    %57 = tpu.concatenate %54, %56 in 0 : vector<6x48xf32>, vector<6x48xf32> -> vector<12x48xf32>
    %58 = arith.addf %57, %5 : vector<12x48xf32>
    %59 = vector.extract_strided_slice %51 {offsets = [0, 0], sizes = [12, 16], strides = [1, 1]} : vector<12x48xf32> to vector<12x16xf32>
    %60 = vector.extract_strided_slice %58 {offsets = [0, 0], sizes = [12, 16], strides = [1, 1]} : vector<12x48xf32> to vector<12x16xf32>
    %61 = arith.addf %59, %60 : vector<12x16xf32>
    %62 = arith.negf %61 : vector<12x16xf32>
    %63 = math.exp %62 : vector<12x16xf32>
    %cst_29 = arith.constant 1.000000e+00 : f32
    %64 = vector.broadcast %cst_29 : f32 to vector<12x16xf32>
    %65 = arith.addf %64, %63 : vector<12x16xf32>
    %66 = arith.divf %64, %65 : vector<12x16xf32>
    %67 = vector.extract_strided_slice %51 {offsets = [0, 16], sizes = [12, 16], strides = [1, 1]} : vector<12x48xf32> to vector<12x16xf32>
    %68 = vector.extract_strided_slice %58 {offsets = [0, 16], sizes = [12, 16], strides = [1, 1]} : vector<12x48xf32> to vector<12x16xf32>
    %69 = arith.addf %67, %68 : vector<12x16xf32>
    %70 = arith.negf %69 : vector<12x16xf32>
    %71 = math.exp %70 : vector<12x16xf32>
    %cst_30 = arith.constant 1.000000e+00 : f32
    %72 = vector.broadcast %cst_30 : f32 to vector<12x16xf32>
    %73 = arith.addf %72, %71 : vector<12x16xf32>
    %74 = arith.divf %72, %73 : vector<12x16xf32>
    %75 = vector.extract_strided_slice %51 {offsets = [0, 32], sizes = [12, 16], strides = [1, 1]} : vector<12x48xf32> to vector<12x16xf32>
    %76 = vector.extract_strided_slice %58 {offsets = [0, 32], sizes = [12, 16], strides = [1, 1]} : vector<12x48xf32> to vector<12x16xf32>
    %77 = arith.mulf %66, %76 : vector<12x16xf32>
    %78 = arith.addf %75, %77 : vector<12x16xf32>
    %79 = math.tanh %78 : vector<12x16xf32>
    %cst_31 = arith.constant 1.000000e+00 : f32
    %80 = vector.broadcast %cst_31 : f32 to vector<12x16xf32>
    %81 = arith.subf %80, %74 : vector<12x16xf32>
    %82 = arith.mulf %81, %79 : vector<12x16xf32>
    %83 = arith.mulf %74, %52 : vector<12x16xf32>
    %84 = arith.addf %82, %83 : vector<12x16xf32>
    %c0_32 = arith.constant 0 : index
    %c0_33 = arith.constant 0 : index
    %85 = vector.load %arg7[%c0_32, %c0_33] : memref<12x16xf32, #tpu.memory_space<vmem>>, vector<12x16xf32>
    tpu.vector_store %arg7[%c0_32, %c0_33], %84 {strides = array<i32>} : memref<12x16xf32, #tpu.memory_space<vmem>>, vector<12x16xf32>,
    %86 = vector.extract_strided_slice %84 {offsets = [0, 0], sizes = [6, 16], strides = [1, 1]} : vector<12x16xf32> to vector<6x16xf32>
    %c1_34 = arith.constant 1 : index
    %c0_35 = arith.constant 0 : index
    %c0_36 = arith.constant 0 : index
    %87 = vector.load %arg5[%c1_34, %c0_35, %c0_36] : memref<8x6x16xf32, #tpu.memory_space<vmem>>, vector<1x6x16xf32>
    %88 = vector.shape_cast %87 : vector<1x6x16xf32> to vector<6x16xf32>
    %89 = vector.shape_cast %86 : vector<6x16xf32> to vector<1x6x16xf32>
    tpu.vector_store %arg5[%c1_34, %c0_35, %c0_36], %89 {strides = array<i32>} : memref<8x6x16xf32, #tpu.memory_space<vmem>>, vector<1x6x16xf32>,
    %90 = vector.extract_strided_slice %84 {offsets = [6, 0], sizes = [6, 16], strides = [1, 1]} : vector<12x16xf32> to vector<6x16xf32>
    %c1_37 = arith.constant 1 : index
    %c0_38 = arith.constant 0 : index
    %c0_39 = arith.constant 0 : index
    %91 = vector.load %arg6[%c1_37, %c0_38, %c0_39] : memref<8x6x16xf32, #tpu.memory_space<vmem>>, vector<1x6x16xf32>
    %92 = vector.shape_cast %91 : vector<1x6x16xf32> to vector<6x16xf32>
    %93 = vector.shape_cast %90 : vector<6x16xf32> to vector<1x6x16xf32>
    tpu.vector_store %arg6[%c1_37, %c0_38, %c0_39], %93 {strides = array<i32>} : memref<8x6x16xf32, #tpu.memory_space<vmem>>, vector<1x6x16xf32>,
    %c2 = arith.constant 2 : index
    %c0_40 = arith.constant 0 : index
    %c0_41 = arith.constant 0 : index
    %94 = vector.load %arg1[%c2, %c0_40, %c0_41] : memref<8x12x48xf32, #tpu.memory_space<vmem>>, vector<1x12x48xf32>
    %95 = vector.shape_cast %94 : vector<1x12x48xf32> to vector<12x48xf32>
    %c0_42 = arith.constant 0 : index
    %c0_43 = arith.constant 0 : index
    %96 = vector.load %arg7[%c0_42, %c0_43] : memref<12x16xf32, #tpu.memory_space<vmem>>, vector<12x16xf32>
    %97 = vector.extract_strided_slice %96 {offsets = [0, 0], sizes = [6, 16], strides = [1, 1]} : vector<12x16xf32> to vector<6x16xf32>
    %cst_44 = arith.constant dense<0.000000e+00> : vector<6x48xf32>
    %98 = tpu.matmul %97, %3, %cst_44 {dimension_numbers = #tpu.dot_dimension_numbers<[1], [0], [0], [1], [0, 0, 1, 1], [], []>} : vector<6x16xf32>, vector<16x48xf32>, vector<6x48xf32> -> vector<6x48xf32>
    %99 = vector.extract_strided_slice %96 {offsets = [6, 0], sizes = [6, 16], strides = [1, 1]} : vector<12x16xf32> to vector<6x16xf32>
    %cst_45 = arith.constant dense<0.000000e+00> : vector<6x48xf32>
    %100 = tpu.matmul %99, %4, %cst_45 {dimension_numbers = #tpu.dot_dimension_numbers<[1], [0], [0], [1], [0, 0, 1, 1], [], []>} : vector<6x16xf32>, vector<16x48xf32>, vector<6x48xf32> -> vector<6x48xf32>
    %101 = tpu.concatenate %98, %100 in 0 : vector<6x48xf32>, vector<6x48xf32> -> vector<12x48xf32>
    %102 = arith.addf %101, %5 : vector<12x48xf32>
    %103 = vector.extract_strided_slice %95 {offsets = [0, 0], sizes = [12, 16], strides = [1, 1]} : vector<12x48xf32> to vector<12x16xf32>
    %104 = vector.extract_strided_slice %102 {offsets = [0, 0], sizes = [12, 16], strides = [1, 1]} : vector<12x48xf32> to vector<12x16xf32>
    %105 = arith.addf %103, %104 : vector<12x16xf32>
    %106 = arith.negf %105 : vector<12x16xf32>
    %107 = math.exp %106 : vector<12x16xf32>
    %cst_46 = arith.constant 1.000000e+00 : f32
    %108 = vector.broadcast %cst_46 : f32 to vector<12x16xf32>
    %109 = arith.addf %108, %107 : vector<12x16xf32>
    %110 = arith.divf %108, %109 : vector<12x16xf32>
    %111 = vector.extract_strided_slice %95 {offsets = [0, 16], sizes = [12, 16], strides = [1, 1]} : vector<12x48xf32> to vector<12x16xf32>
    %112 = vector.extract_strided_slice %102 {offsets = [0, 16], sizes = [12, 16], strides = [1, 1]} : vector<12x48xf32> to vector<12x16xf32>
    %113 = arith.addf %111, %112 : vector<12x16xf32>
    %114 = arith.negf %113 : vector<12x16xf32>
    %115 = math.exp %114 : vector<12x16xf32>
    %cst_47 = arith.constant 1.000000e+00 : f32
    %116 = vector.broadcast %cst_47 : f32 to vector<12x16xf32>
    %117 = arith.addf %116, %115 : vector<12x16xf32>
    %118 = arith.divf %116, %117 : vector<12x16xf32>
    %119 = vector.extract_strided_slice %95 {offsets = [0, 32], sizes = [12, 16], strides = [1, 1]} : vector<12x48xf32> to vector<12x16xf32>
    %120 = vector.extract_strided_slice %102 {offsets = [0, 32], sizes = [12, 16], strides = [1, 1]} : vector<12x48xf32> to vector<12x16xf32>
    %121 = arith.mulf %110, %120 : vector<12x16xf32>
    %122 = arith.addf %119, %121 : vector<12x16xf32>
    %123 = math.tanh %122 : vector<12x16xf32>
    %cst_48 = arith.constant 1.000000e+00 : f32
    %124 = vector.broadcast %cst_48 : f32 to vector<12x16xf32>
    %125 = arith.subf %124, %118 : vector<12x16xf32>
    %126 = arith.mulf %125, %123 : vector<12x16xf32>
    %127 = arith.mulf %118, %96 : vector<12x16xf32>
    %128 = arith.addf %126, %127 : vector<12x16xf32>
    %c0_49 = arith.constant 0 : index
    %c0_50 = arith.constant 0 : index
    %129 = vector.load %arg7[%c0_49, %c0_50] : memref<12x16xf32, #tpu.memory_space<vmem>>, vector<12x16xf32>
    tpu.vector_store %arg7[%c0_49, %c0_50], %128 {strides = array<i32>} : memref<12x16xf32, #tpu.memory_space<vmem>>, vector<12x16xf32>,
    %130 = vector.extract_strided_slice %128 {offsets = [0, 0], sizes = [6, 16], strides = [1, 1]} : vector<12x16xf32> to vector<6x16xf32>
    %c2_51 = arith.constant 2 : index
    %c0_52 = arith.constant 0 : index
    %c0_53 = arith.constant 0 : index
    %131 = vector.load %arg5[%c2_51, %c0_52, %c0_53] : memref<8x6x16xf32, #tpu.memory_space<vmem>>, vector<1x6x16xf32>
    %132 = vector.shape_cast %131 : vector<1x6x16xf32> to vector<6x16xf32>
    %133 = vector.shape_cast %130 : vector<6x16xf32> to vector<1x6x16xf32>
    tpu.vector_store %arg5[%c2_51, %c0_52, %c0_53], %133 {strides = array<i32>} : memref<8x6x16xf32, #tpu.memory_space<vmem>>, vector<1x6x16xf32>,
    %134 = vector.extract_strided_slice %128 {offsets = [6, 0], sizes = [6, 16], strides = [1, 1]} : vector<12x16xf32> to vector<6x16xf32>
    %c2_54 = arith.constant 2 : index
    %c0_55 = arith.constant 0 : index
    %c0_56 = arith.constant 0 : index
    %135 = vector.load %arg6[%c2_54, %c0_55, %c0_56] : memref<8x6x16xf32, #tpu.memory_space<vmem>>, vector<1x6x16xf32>
    %136 = vector.shape_cast %135 : vector<1x6x16xf32> to vector<6x16xf32>
    %137 = vector.shape_cast %134 : vector<6x16xf32> to vector<1x6x16xf32>
    tpu.vector_store %arg6[%c2_54, %c0_55, %c0_56], %137 {strides = array<i32>} : memref<8x6x16xf32, #tpu.memory_space<vmem>>, vector<1x6x16xf32>,
    %c3 = arith.constant 3 : index
    %c0_57 = arith.constant 0 : index
    %c0_58 = arith.constant 0 : index
    %138 = vector.load %arg1[%c3, %c0_57, %c0_58] : memref<8x12x48xf32, #tpu.memory_space<vmem>>, vector<1x12x48xf32>
    %139 = vector.shape_cast %138 : vector<1x12x48xf32> to vector<12x48xf32>
    %c0_59 = arith.constant 0 : index
    %c0_60 = arith.constant 0 : index
    %140 = vector.load %arg7[%c0_59, %c0_60] : memref<12x16xf32, #tpu.memory_space<vmem>>, vector<12x16xf32>
    %141 = vector.extract_strided_slice %140 {offsets = [0, 0], sizes = [6, 16], strides = [1, 1]} : vector<12x16xf32> to vector<6x16xf32>
    %cst_61 = arith.constant dense<0.000000e+00> : vector<6x48xf32>
    %142 = tpu.matmul %141, %3, %cst_61 {dimension_numbers = #tpu.dot_dimension_numbers<[1], [0], [0], [1], [0, 0, 1, 1], [], []>} : vector<6x16xf32>, vector<16x48xf32>, vector<6x48xf32> -> vector<6x48xf32>
    %143 = vector.extract_strided_slice %140 {offsets = [6, 0], sizes = [6, 16], strides = [1, 1]} : vector<12x16xf32> to vector<6x16xf32>
    %cst_62 = arith.constant dense<0.000000e+00> : vector<6x48xf32>
    %144 = tpu.matmul %143, %4, %cst_62 {dimension_numbers = #tpu.dot_dimension_numbers<[1], [0], [0], [1], [0, 0, 1, 1], [], []>} : vector<6x16xf32>, vector<16x48xf32>, vector<6x48xf32> -> vector<6x48xf32>
    %145 = tpu.concatenate %142, %144 in 0 : vector<6x48xf32>, vector<6x48xf32> -> vector<12x48xf32>
    %146 = arith.addf %145, %5 : vector<12x48xf32>
    %147 = vector.extract_strided_slice %139 {offsets = [0, 0], sizes = [12, 16], strides = [1, 1]} : vector<12x48xf32> to vector<12x16xf32>
    %148 = vector.extract_strided_slice %146 {offsets = [0, 0], sizes = [12, 16], strides = [1, 1]} : vector<12x48xf32> to vector<12x16xf32>
    %149 = arith.addf %147, %148 : vector<12x16xf32>
    %150 = arith.negf %149 : vector<12x16xf32>
    %151 = math.exp %150 : vector<12x16xf32>
    %cst_63 = arith.constant 1.000000e+00 : f32
    %152 = vector.broadcast %cst_63 : f32 to vector<12x16xf32>
    %153 = arith.addf %152, %151 : vector<12x16xf32>
    %154 = arith.divf %152, %153 : vector<12x16xf32>
    %155 = vector.extract_strided_slice %139 {offsets = [0, 16], sizes = [12, 16], strides = [1, 1]} : vector<12x48xf32> to vector<12x16xf32>
    %156 = vector.extract_strided_slice %146 {offsets = [0, 16], sizes = [12, 16], strides = [1, 1]} : vector<12x48xf32> to vector<12x16xf32>
    %157 = arith.addf %155, %156 : vector<12x16xf32>
    %158 = arith.negf %157 : vector<12x16xf32>
    %159 = math.exp %158 : vector<12x16xf32>
    %cst_64 = arith.constant 1.000000e+00 : f32
    %160 = vector.broadcast %cst_64 : f32 to vector<12x16xf32>
    %161 = arith.addf %160, %159 : vector<12x16xf32>
    %162 = arith.divf %160, %161 : vector<12x16xf32>
    %163 = vector.extract_strided_slice %139 {offsets = [0, 32], sizes = [12, 16], strides = [1, 1]} : vector<12x48xf32> to vector<12x16xf32>
    %164 = vector.extract_strided_slice %146 {offsets = [0, 32], sizes = [12, 16], strides = [1, 1]} : vector<12x48xf32> to vector<12x16xf32>
    %165 = arith.mulf %154, %164 : vector<12x16xf32>
    %166 = arith.addf %163, %165 : vector<12x16xf32>
    %167 = math.tanh %166 : vector<12x16xf32>
    %cst_65 = arith.constant 1.000000e+00 : f32
    %168 = vector.broadcast %cst_65 : f32 to vector<12x16xf32>
    %169 = arith.subf %168, %162 : vector<12x16xf32>
    %170 = arith.mulf %169, %167 : vector<12x16xf32>
    %171 = arith.mulf %162, %140 : vector<12x16xf32>
    %172 = arith.addf %170, %171 : vector<12x16xf32>
    %c0_66 = arith.constant 0 : index
    %c0_67 = arith.constant 0 : index
    %173 = vector.load %arg7[%c0_66, %c0_67] : memref<12x16xf32, #tpu.memory_space<vmem>>, vector<12x16xf32>
    tpu.vector_store %arg7[%c0_66, %c0_67], %172 {strides = array<i32>} : memref<12x16xf32, #tpu.memory_space<vmem>>, vector<12x16xf32>,
    %174 = vector.extract_strided_slice %172 {offsets = [0, 0], sizes = [6, 16], strides = [1, 1]} : vector<12x16xf32> to vector<6x16xf32>
    %c3_68 = arith.constant 3 : index
    %c0_69 = arith.constant 0 : index
    %c0_70 = arith.constant 0 : index
    %175 = vector.load %arg5[%c3_68, %c0_69, %c0_70] : memref<8x6x16xf32, #tpu.memory_space<vmem>>, vector<1x6x16xf32>
    %176 = vector.shape_cast %175 : vector<1x6x16xf32> to vector<6x16xf32>
    %177 = vector.shape_cast %174 : vector<6x16xf32> to vector<1x6x16xf32>
    tpu.vector_store %arg5[%c3_68, %c0_69, %c0_70], %177 {strides = array<i32>} : memref<8x6x16xf32, #tpu.memory_space<vmem>>, vector<1x6x16xf32>,
    %178 = vector.extract_strided_slice %172 {offsets = [6, 0], sizes = [6, 16], strides = [1, 1]} : vector<12x16xf32> to vector<6x16xf32>
    %c3_71 = arith.constant 3 : index
    %c0_72 = arith.constant 0 : index
    %c0_73 = arith.constant 0 : index
    %179 = vector.load %arg6[%c3_71, %c0_72, %c0_73] : memref<8x6x16xf32, #tpu.memory_space<vmem>>, vector<1x6x16xf32>
    %180 = vector.shape_cast %179 : vector<1x6x16xf32> to vector<6x16xf32>
    %181 = vector.shape_cast %178 : vector<6x16xf32> to vector<1x6x16xf32>
    tpu.vector_store %arg6[%c3_71, %c0_72, %c0_73], %181 {strides = array<i32>} : memref<8x6x16xf32, #tpu.memory_space<vmem>>, vector<1x6x16xf32>,
    %c4 = arith.constant 4 : index
    %c0_74 = arith.constant 0 : index
    %c0_75 = arith.constant 0 : index
    %182 = vector.load %arg1[%c4, %c0_74, %c0_75] : memref<8x12x48xf32, #tpu.memory_space<vmem>>, vector<1x12x48xf32>
    %183 = vector.shape_cast %182 : vector<1x12x48xf32> to vector<12x48xf32>
    %c0_76 = arith.constant 0 : index
    %c0_77 = arith.constant 0 : index
    %184 = vector.load %arg7[%c0_76, %c0_77] : memref<12x16xf32, #tpu.memory_space<vmem>>, vector<12x16xf32>
    %185 = vector.extract_strided_slice %184 {offsets = [0, 0], sizes = [6, 16], strides = [1, 1]} : vector<12x16xf32> to vector<6x16xf32>
    %cst_78 = arith.constant dense<0.000000e+00> : vector<6x48xf32>
    %186 = tpu.matmul %185, %3, %cst_78 {dimension_numbers = #tpu.dot_dimension_numbers<[1], [0], [0], [1], [0, 0, 1, 1], [], []>} : vector<6x16xf32>, vector<16x48xf32>, vector<6x48xf32> -> vector<6x48xf32>
    %187 = vector.extract_strided_slice %184 {offsets = [6, 0], sizes = [6, 16], strides = [1, 1]} : vector<12x16xf32> to vector<6x16xf32>
    %cst_79 = arith.constant dense<0.000000e+00> : vector<6x48xf32>
    %188 = tpu.matmul %187, %4, %cst_79 {dimension_numbers = #tpu.dot_dimension_numbers<[1], [0], [0], [1], [0, 0, 1, 1], [], []>} : vector<6x16xf32>, vector<16x48xf32>, vector<6x48xf32> -> vector<6x48xf32>
    %189 = tpu.concatenate %186, %188 in 0 : vector<6x48xf32>, vector<6x48xf32> -> vector<12x48xf32>
    %190 = arith.addf %189, %5 : vector<12x48xf32>
    %191 = vector.extract_strided_slice %183 {offsets = [0, 0], sizes = [12, 16], strides = [1, 1]} : vector<12x48xf32> to vector<12x16xf32>
    %192 = vector.extract_strided_slice %190 {offsets = [0, 0], sizes = [12, 16], strides = [1, 1]} : vector<12x48xf32> to vector<12x16xf32>
    %193 = arith.addf %191, %192 : vector<12x16xf32>
    %194 = arith.negf %193 : vector<12x16xf32>
    %195 = math.exp %194 : vector<12x16xf32>
    %cst_80 = arith.constant 1.000000e+00 : f32
    %196 = vector.broadcast %cst_80 : f32 to vector<12x16xf32>
    %197 = arith.addf %196, %195 : vector<12x16xf32>
    %198 = arith.divf %196, %197 : vector<12x16xf32>
    %199 = vector.extract_strided_slice %183 {offsets = [0, 16], sizes = [12, 16], strides = [1, 1]} : vector<12x48xf32> to vector<12x16xf32>
    %200 = vector.extract_strided_slice %190 {offsets = [0, 16], sizes = [12, 16], strides = [1, 1]} : vector<12x48xf32> to vector<12x16xf32>
    %201 = arith.addf %199, %200 : vector<12x16xf32>
    %202 = arith.negf %201 : vector<12x16xf32>
    %203 = math.exp %202 : vector<12x16xf32>
    %cst_81 = arith.constant 1.000000e+00 : f32
    %204 = vector.broadcast %cst_81 : f32 to vector<12x16xf32>
    %205 = arith.addf %204, %203 : vector<12x16xf32>
    %206 = arith.divf %204, %205 : vector<12x16xf32>
    %207 = vector.extract_strided_slice %183 {offsets = [0, 32], sizes = [12, 16], strides = [1, 1]} : vector<12x48xf32> to vector<12x16xf32>
    %208 = vector.extract_strided_slice %190 {offsets = [0, 32], sizes = [12, 16], strides = [1, 1]} : vector<12x48xf32> to vector<12x16xf32>
    %209 = arith.mulf %198, %208 : vector<12x16xf32>
    %210 = arith.addf %207, %209 : vector<12x16xf32>
    %211 = math.tanh %210 : vector<12x16xf32>
    %cst_82 = arith.constant 1.000000e+00 : f32
    %212 = vector.broadcast %cst_82 : f32 to vector<12x16xf32>
    %213 = arith.subf %212, %206 : vector<12x16xf32>
    %214 = arith.mulf %213, %211 : vector<12x16xf32>
    %215 = arith.mulf %206, %184 : vector<12x16xf32>
    %216 = arith.addf %214, %215 : vector<12x16xf32>
    %c0_83 = arith.constant 0 : index
    %c0_84 = arith.constant 0 : index
    %217 = vector.load %arg7[%c0_83, %c0_84] : memref<12x16xf32, #tpu.memory_space<vmem>>, vector<12x16xf32>
    tpu.vector_store %arg7[%c0_83, %c0_84], %216 {strides = array<i32>} : memref<12x16xf32, #tpu.memory_space<vmem>>, vector<12x16xf32>,
    %218 = vector.extract_strided_slice %216 {offsets = [0, 0], sizes = [6, 16], strides = [1, 1]} : vector<12x16xf32> to vector<6x16xf32>
    %c4_85 = arith.constant 4 : index
    %c0_86 = arith.constant 0 : index
    %c0_87 = arith.constant 0 : index
    %219 = vector.load %arg5[%c4_85, %c0_86, %c0_87] : memref<8x6x16xf32, #tpu.memory_space<vmem>>, vector<1x6x16xf32>
    %220 = vector.shape_cast %219 : vector<1x6x16xf32> to vector<6x16xf32>
    %221 = vector.shape_cast %218 : vector<6x16xf32> to vector<1x6x16xf32>
    tpu.vector_store %arg5[%c4_85, %c0_86, %c0_87], %221 {strides = array<i32>} : memref<8x6x16xf32, #tpu.memory_space<vmem>>, vector<1x6x16xf32>,
    %222 = vector.extract_strided_slice %216 {offsets = [6, 0], sizes = [6, 16], strides = [1, 1]} : vector<12x16xf32> to vector<6x16xf32>
    %c4_88 = arith.constant 4 : index
    %c0_89 = arith.constant 0 : index
    %c0_90 = arith.constant 0 : index
    %223 = vector.load %arg6[%c4_88, %c0_89, %c0_90] : memref<8x6x16xf32, #tpu.memory_space<vmem>>, vector<1x6x16xf32>
    %224 = vector.shape_cast %223 : vector<1x6x16xf32> to vector<6x16xf32>
    %225 = vector.shape_cast %222 : vector<6x16xf32> to vector<1x6x16xf32>
    tpu.vector_store %arg6[%c4_88, %c0_89, %c0_90], %225 {strides = array<i32>} : memref<8x6x16xf32, #tpu.memory_space<vmem>>, vector<1x6x16xf32>,
    %c5 = arith.constant 5 : index
    %c0_91 = arith.constant 0 : index
    %c0_92 = arith.constant 0 : index
    %226 = vector.load %arg1[%c5, %c0_91, %c0_92] : memref<8x12x48xf32, #tpu.memory_space<vmem>>, vector<1x12x48xf32>
    %227 = vector.shape_cast %226 : vector<1x12x48xf32> to vector<12x48xf32>
    %c0_93 = arith.constant 0 : index
    %c0_94 = arith.constant 0 : index
    %228 = vector.load %arg7[%c0_93, %c0_94] : memref<12x16xf32, #tpu.memory_space<vmem>>, vector<12x16xf32>
    %229 = vector.extract_strided_slice %228 {offsets = [0, 0], sizes = [6, 16], strides = [1, 1]} : vector<12x16xf32> to vector<6x16xf32>
    %cst_95 = arith.constant dense<0.000000e+00> : vector<6x48xf32>
    %230 = tpu.matmul %229, %3, %cst_95 {dimension_numbers = #tpu.dot_dimension_numbers<[1], [0], [0], [1], [0, 0, 1, 1], [], []>} : vector<6x16xf32>, vector<16x48xf32>, vector<6x48xf32> -> vector<6x48xf32>
    %231 = vector.extract_strided_slice %228 {offsets = [6, 0], sizes = [6, 16], strides = [1, 1]} : vector<12x16xf32> to vector<6x16xf32>
    %cst_96 = arith.constant dense<0.000000e+00> : vector<6x48xf32>
    %232 = tpu.matmul %231, %4, %cst_96 {dimension_numbers = #tpu.dot_dimension_numbers<[1], [0], [0], [1], [0, 0, 1, 1], [], []>} : vector<6x16xf32>, vector<16x48xf32>, vector<6x48xf32> -> vector<6x48xf32>
    %233 = tpu.concatenate %230, %232 in 0 : vector<6x48xf32>, vector<6x48xf32> -> vector<12x48xf32>
    %234 = arith.addf %233, %5 : vector<12x48xf32>
    %235 = vector.extract_strided_slice %227 {offsets = [0, 0], sizes = [12, 16], strides = [1, 1]} : vector<12x48xf32> to vector<12x16xf32>
    %236 = vector.extract_strided_slice %234 {offsets = [0, 0], sizes = [12, 16], strides = [1, 1]} : vector<12x48xf32> to vector<12x16xf32>
    %237 = arith.addf %235, %236 : vector<12x16xf32>
    %238 = arith.negf %237 : vector<12x16xf32>
    %239 = math.exp %238 : vector<12x16xf32>
    %cst_97 = arith.constant 1.000000e+00 : f32
    %240 = vector.broadcast %cst_97 : f32 to vector<12x16xf32>
    %241 = arith.addf %240, %239 : vector<12x16xf32>
    %242 = arith.divf %240, %241 : vector<12x16xf32>
    %243 = vector.extract_strided_slice %227 {offsets = [0, 16], sizes = [12, 16], strides = [1, 1]} : vector<12x48xf32> to vector<12x16xf32>
    %244 = vector.extract_strided_slice %234 {offsets = [0, 16], sizes = [12, 16], strides = [1, 1]} : vector<12x48xf32> to vector<12x16xf32>
    %245 = arith.addf %243, %244 : vector<12x16xf32>
    %246 = arith.negf %245 : vector<12x16xf32>
    %247 = math.exp %246 : vector<12x16xf32>
    %cst_98 = arith.constant 1.000000e+00 : f32
    %248 = vector.broadcast %cst_98 : f32 to vector<12x16xf32>
    %249 = arith.addf %248, %247 : vector<12x16xf32>
    %250 = arith.divf %248, %249 : vector<12x16xf32>
    %251 = vector.extract_strided_slice %227 {offsets = [0, 32], sizes = [12, 16], strides = [1, 1]} : vector<12x48xf32> to vector<12x16xf32>
    %252 = vector.extract_strided_slice %234 {offsets = [0, 32], sizes = [12, 16], strides = [1, 1]} : vector<12x48xf32> to vector<12x16xf32>
    %253 = arith.mulf %242, %252 : vector<12x16xf32>
    %254 = arith.addf %251, %253 : vector<12x16xf32>
    %255 = math.tanh %254 : vector<12x16xf32>
    %cst_99 = arith.constant 1.000000e+00 : f32
    %256 = vector.broadcast %cst_99 : f32 to vector<12x16xf32>
    %257 = arith.subf %256, %250 : vector<12x16xf32>
    %258 = arith.mulf %257, %255 : vector<12x16xf32>
    %259 = arith.mulf %250, %228 : vector<12x16xf32>
    %260 = arith.addf %258, %259 : vector<12x16xf32>
    %c0_100 = arith.constant 0 : index
    %c0_101 = arith.constant 0 : index
    %261 = vector.load %arg7[%c0_100, %c0_101] : memref<12x16xf32, #tpu.memory_space<vmem>>, vector<12x16xf32>
    tpu.vector_store %arg7[%c0_100, %c0_101], %260 {strides = array<i32>} : memref<12x16xf32, #tpu.memory_space<vmem>>, vector<12x16xf32>,
    %262 = vector.extract_strided_slice %260 {offsets = [0, 0], sizes = [6, 16], strides = [1, 1]} : vector<12x16xf32> to vector<6x16xf32>
    %c5_102 = arith.constant 5 : index
    %c0_103 = arith.constant 0 : index
    %c0_104 = arith.constant 0 : index
    %263 = vector.load %arg5[%c5_102, %c0_103, %c0_104] : memref<8x6x16xf32, #tpu.memory_space<vmem>>, vector<1x6x16xf32>
    %264 = vector.shape_cast %263 : vector<1x6x16xf32> to vector<6x16xf32>
    %265 = vector.shape_cast %262 : vector<6x16xf32> to vector<1x6x16xf32>
    tpu.vector_store %arg5[%c5_102, %c0_103, %c0_104], %265 {strides = array<i32>} : memref<8x6x16xf32, #tpu.memory_space<vmem>>, vector<1x6x16xf32>,
    %266 = vector.extract_strided_slice %260 {offsets = [6, 0], sizes = [6, 16], strides = [1, 1]} : vector<12x16xf32> to vector<6x16xf32>
    %c5_105 = arith.constant 5 : index
    %c0_106 = arith.constant 0 : index
    %c0_107 = arith.constant 0 : index
    %267 = vector.load %arg6[%c5_105, %c0_106, %c0_107] : memref<8x6x16xf32, #tpu.memory_space<vmem>>, vector<1x6x16xf32>
    %268 = vector.shape_cast %267 : vector<1x6x16xf32> to vector<6x16xf32>
    %269 = vector.shape_cast %266 : vector<6x16xf32> to vector<1x6x16xf32>
    tpu.vector_store %arg6[%c5_105, %c0_106, %c0_107], %269 {strides = array<i32>} : memref<8x6x16xf32, #tpu.memory_space<vmem>>, vector<1x6x16xf32>,
    %c6 = arith.constant 6 : index
    %c0_108 = arith.constant 0 : index
    %c0_109 = arith.constant 0 : index
    %270 = vector.load %arg1[%c6, %c0_108, %c0_109] : memref<8x12x48xf32, #tpu.memory_space<vmem>>, vector<1x12x48xf32>
    %271 = vector.shape_cast %270 : vector<1x12x48xf32> to vector<12x48xf32>
    %c0_110 = arith.constant 0 : index
    %c0_111 = arith.constant 0 : index
    %272 = vector.load %arg7[%c0_110, %c0_111] : memref<12x16xf32, #tpu.memory_space<vmem>>, vector<12x16xf32>
    %273 = vector.extract_strided_slice %272 {offsets = [0, 0], sizes = [6, 16], strides = [1, 1]} : vector<12x16xf32> to vector<6x16xf32>
    %cst_112 = arith.constant dense<0.000000e+00> : vector<6x48xf32>
    %274 = tpu.matmul %273, %3, %cst_112 {dimension_numbers = #tpu.dot_dimension_numbers<[1], [0], [0], [1], [0, 0, 1, 1], [], []>} : vector<6x16xf32>, vector<16x48xf32>, vector<6x48xf32> -> vector<6x48xf32>
    %275 = vector.extract_strided_slice %272 {offsets = [6, 0], sizes = [6, 16], strides = [1, 1]} : vector<12x16xf32> to vector<6x16xf32>
    %cst_113 = arith.constant dense<0.000000e+00> : vector<6x48xf32>
    %276 = tpu.matmul %275, %4, %cst_113 {dimension_numbers = #tpu.dot_dimension_numbers<[1], [0], [0], [1], [0, 0, 1, 1], [], []>} : vector<6x16xf32>, vector<16x48xf32>, vector<6x48xf32> -> vector<6x48xf32>
    %277 = tpu.concatenate %274, %276 in 0 : vector<6x48xf32>, vector<6x48xf32> -> vector<12x48xf32>
    %278 = arith.addf %277, %5 : vector<12x48xf32>
    %279 = vector.extract_strided_slice %271 {offsets = [0, 0], sizes = [12, 16], strides = [1, 1]} : vector<12x48xf32> to vector<12x16xf32>
    %280 = vector.extract_strided_slice %278 {offsets = [0, 0], sizes = [12, 16], strides = [1, 1]} : vector<12x48xf32> to vector<12x16xf32>
    %281 = arith.addf %279, %280 : vector<12x16xf32>
    %282 = arith.negf %281 : vector<12x16xf32>
    %283 = math.exp %282 : vector<12x16xf32>
    %cst_114 = arith.constant 1.000000e+00 : f32
    %284 = vector.broadcast %cst_114 : f32 to vector<12x16xf32>
    %285 = arith.addf %284, %283 : vector<12x16xf32>
    %286 = arith.divf %284, %285 : vector<12x16xf32>
    %287 = vector.extract_strided_slice %271 {offsets = [0, 16], sizes = [12, 16], strides = [1, 1]} : vector<12x48xf32> to vector<12x16xf32>
    %288 = vector.extract_strided_slice %278 {offsets = [0, 16], sizes = [12, 16], strides = [1, 1]} : vector<12x48xf32> to vector<12x16xf32>
    %289 = arith.addf %287, %288 : vector<12x16xf32>
    %290 = arith.negf %289 : vector<12x16xf32>
    %291 = math.exp %290 : vector<12x16xf32>
    %cst_115 = arith.constant 1.000000e+00 : f32
    %292 = vector.broadcast %cst_115 : f32 to vector<12x16xf32>
    %293 = arith.addf %292, %291 : vector<12x16xf32>
    %294 = arith.divf %292, %293 : vector<12x16xf32>
    %295 = vector.extract_strided_slice %271 {offsets = [0, 32], sizes = [12, 16], strides = [1, 1]} : vector<12x48xf32> to vector<12x16xf32>
    %296 = vector.extract_strided_slice %278 {offsets = [0, 32], sizes = [12, 16], strides = [1, 1]} : vector<12x48xf32> to vector<12x16xf32>
    %297 = arith.mulf %286, %296 : vector<12x16xf32>
    %298 = arith.addf %295, %297 : vector<12x16xf32>
    %299 = math.tanh %298 : vector<12x16xf32>
    %cst_116 = arith.constant 1.000000e+00 : f32
    %300 = vector.broadcast %cst_116 : f32 to vector<12x16xf32>
    %301 = arith.subf %300, %294 : vector<12x16xf32>
    %302 = arith.mulf %301, %299 : vector<12x16xf32>
    %303 = arith.mulf %294, %272 : vector<12x16xf32>
    %304 = arith.addf %302, %303 : vector<12x16xf32>
    %c0_117 = arith.constant 0 : index
    %c0_118 = arith.constant 0 : index
    %305 = vector.load %arg7[%c0_117, %c0_118] : memref<12x16xf32, #tpu.memory_space<vmem>>, vector<12x16xf32>
    tpu.vector_store %arg7[%c0_117, %c0_118], %304 {strides = array<i32>} : memref<12x16xf32, #tpu.memory_space<vmem>>, vector<12x16xf32>,
    %306 = vector.extract_strided_slice %304 {offsets = [0, 0], sizes = [6, 16], strides = [1, 1]} : vector<12x16xf32> to vector<6x16xf32>
    %c6_119 = arith.constant 6 : index
    %c0_120 = arith.constant 0 : index
    %c0_121 = arith.constant 0 : index
    %307 = vector.load %arg5[%c6_119, %c0_120, %c0_121] : memref<8x6x16xf32, #tpu.memory_space<vmem>>, vector<1x6x16xf32>
    %308 = vector.shape_cast %307 : vector<1x6x16xf32> to vector<6x16xf32>
    %309 = vector.shape_cast %306 : vector<6x16xf32> to vector<1x6x16xf32>
    tpu.vector_store %arg5[%c6_119, %c0_120, %c0_121], %309 {strides = array<i32>} : memref<8x6x16xf32, #tpu.memory_space<vmem>>, vector<1x6x16xf32>,
    %310 = vector.extract_strided_slice %304 {offsets = [6, 0], sizes = [6, 16], strides = [1, 1]} : vector<12x16xf32> to vector<6x16xf32>
    %c6_122 = arith.constant 6 : index
    %c0_123 = arith.constant 0 : index
    %c0_124 = arith.constant 0 : index
    %311 = vector.load %arg6[%c6_122, %c0_123, %c0_124] : memref<8x6x16xf32, #tpu.memory_space<vmem>>, vector<1x6x16xf32>
    %312 = vector.shape_cast %311 : vector<1x6x16xf32> to vector<6x16xf32>
    %313 = vector.shape_cast %310 : vector<6x16xf32> to vector<1x6x16xf32>
    tpu.vector_store %arg6[%c6_122, %c0_123, %c0_124], %313 {strides = array<i32>} : memref<8x6x16xf32, #tpu.memory_space<vmem>>, vector<1x6x16xf32>,
    %c7 = arith.constant 7 : index
    %c0_125 = arith.constant 0 : index
    %c0_126 = arith.constant 0 : index
    %314 = vector.load %arg1[%c7, %c0_125, %c0_126] : memref<8x12x48xf32, #tpu.memory_space<vmem>>, vector<1x12x48xf32>
    %315 = vector.shape_cast %314 : vector<1x12x48xf32> to vector<12x48xf32>
    %c0_127 = arith.constant 0 : index
    %c0_128 = arith.constant 0 : index
    %316 = vector.load %arg7[%c0_127, %c0_128] : memref<12x16xf32, #tpu.memory_space<vmem>>, vector<12x16xf32>
    %317 = vector.extract_strided_slice %316 {offsets = [0, 0], sizes = [6, 16], strides = [1, 1]} : vector<12x16xf32> to vector<6x16xf32>
    %cst_129 = arith.constant dense<0.000000e+00> : vector<6x48xf32>
    %318 = tpu.matmul %317, %3, %cst_129 {dimension_numbers = #tpu.dot_dimension_numbers<[1], [0], [0], [1], [0, 0, 1, 1], [], []>} : vector<6x16xf32>, vector<16x48xf32>, vector<6x48xf32> -> vector<6x48xf32>
    %319 = vector.extract_strided_slice %316 {offsets = [6, 0], sizes = [6, 16], strides = [1, 1]} : vector<12x16xf32> to vector<6x16xf32>
    %cst_130 = arith.constant dense<0.000000e+00> : vector<6x48xf32>
    %320 = tpu.matmul %319, %4, %cst_130 {dimension_numbers = #tpu.dot_dimension_numbers<[1], [0], [0], [1], [0, 0, 1, 1], [], []>} : vector<6x16xf32>, vector<16x48xf32>, vector<6x48xf32> -> vector<6x48xf32>
    %321 = tpu.concatenate %318, %320 in 0 : vector<6x48xf32>, vector<6x48xf32> -> vector<12x48xf32>
    %322 = arith.addf %321, %5 : vector<12x48xf32>
    %323 = vector.extract_strided_slice %315 {offsets = [0, 0], sizes = [12, 16], strides = [1, 1]} : vector<12x48xf32> to vector<12x16xf32>
    %324 = vector.extract_strided_slice %322 {offsets = [0, 0], sizes = [12, 16], strides = [1, 1]} : vector<12x48xf32> to vector<12x16xf32>
    %325 = arith.addf %323, %324 : vector<12x16xf32>
    %326 = arith.negf %325 : vector<12x16xf32>
    %327 = math.exp %326 : vector<12x16xf32>
    %cst_131 = arith.constant 1.000000e+00 : f32
    %328 = vector.broadcast %cst_131 : f32 to vector<12x16xf32>
    %329 = arith.addf %328, %327 : vector<12x16xf32>
    %330 = arith.divf %328, %329 : vector<12x16xf32>
    %331 = vector.extract_strided_slice %315 {offsets = [0, 16], sizes = [12, 16], strides = [1, 1]} : vector<12x48xf32> to vector<12x16xf32>
    %332 = vector.extract_strided_slice %322 {offsets = [0, 16], sizes = [12, 16], strides = [1, 1]} : vector<12x48xf32> to vector<12x16xf32>
    %333 = arith.addf %331, %332 : vector<12x16xf32>
    %334 = arith.negf %333 : vector<12x16xf32>
    %335 = math.exp %334 : vector<12x16xf32>
    %cst_132 = arith.constant 1.000000e+00 : f32
    %336 = vector.broadcast %cst_132 : f32 to vector<12x16xf32>
    %337 = arith.addf %336, %335 : vector<12x16xf32>
    %338 = arith.divf %336, %337 : vector<12x16xf32>
    %339 = vector.extract_strided_slice %315 {offsets = [0, 32], sizes = [12, 16], strides = [1, 1]} : vector<12x48xf32> to vector<12x16xf32>
    %340 = vector.extract_strided_slice %322 {offsets = [0, 32], sizes = [12, 16], strides = [1, 1]} : vector<12x48xf32> to vector<12x16xf32>
    %341 = arith.mulf %330, %340 : vector<12x16xf32>
    %342 = arith.addf %339, %341 : vector<12x16xf32>
    %343 = math.tanh %342 : vector<12x16xf32>
    %cst_133 = arith.constant 1.000000e+00 : f32
    %344 = vector.broadcast %cst_133 : f32 to vector<12x16xf32>
    %345 = arith.subf %344, %338 : vector<12x16xf32>
    %346 = arith.mulf %345, %343 : vector<12x16xf32>
    %347 = arith.mulf %338, %316 : vector<12x16xf32>
    %348 = arith.addf %346, %347 : vector<12x16xf32>
    %c0_134 = arith.constant 0 : index
    %c0_135 = arith.constant 0 : index
    %349 = vector.load %arg7[%c0_134, %c0_135] : memref<12x16xf32, #tpu.memory_space<vmem>>, vector<12x16xf32>
    tpu.vector_store %arg7[%c0_134, %c0_135], %348 {strides = array<i32>} : memref<12x16xf32, #tpu.memory_space<vmem>>, vector<12x16xf32>,
    %350 = vector.extract_strided_slice %348 {offsets = [0, 0], sizes = [6, 16], strides = [1, 1]} : vector<12x16xf32> to vector<6x16xf32>
    %c7_136 = arith.constant 7 : index
    %c0_137 = arith.constant 0 : index
    %c0_138 = arith.constant 0 : index
    %351 = vector.load %arg5[%c7_136, %c0_137, %c0_138] : memref<8x6x16xf32, #tpu.memory_space<vmem>>, vector<1x6x16xf32>
    %352 = vector.shape_cast %351 : vector<1x6x16xf32> to vector<6x16xf32>
    %353 = vector.shape_cast %350 : vector<6x16xf32> to vector<1x6x16xf32>
    tpu.vector_store %arg5[%c7_136, %c0_137, %c0_138], %353 {strides = array<i32>} : memref<8x6x16xf32, #tpu.memory_space<vmem>>, vector<1x6x16xf32>,
    %354 = vector.extract_strided_slice %348 {offsets = [6, 0], sizes = [6, 16], strides = [1, 1]} : vector<12x16xf32> to vector<6x16xf32>
    %c7_139 = arith.constant 7 : index
    %c0_140 = arith.constant 0 : index
    %c0_141 = arith.constant 0 : index
    %355 = vector.load %arg6[%c7_139, %c0_140, %c0_141] : memref<8x6x16xf32, #tpu.memory_space<vmem>>, vector<1x6x16xf32>
    %356 = vector.shape_cast %355 : vector<1x6x16xf32> to vector<6x16xf32>
    %357 = vector.shape_cast %354 : vector<6x16xf32> to vector<1x6x16xf32>
    tpu.vector_store %arg6[%c7_139, %c0_140, %c0_141], %357 {strides = array<i32>} : memref<8x6x16xf32, #tpu.memory_space<vmem>>, vector<1x6x16xf32>,
    return
  }
  func.func @transform_0(%arg0: i32) -> (i32, i32, i32) {
    %c0_i32 = arith.constant 0 : i32
    %c0_i32_0 = arith.constant 0 : i32
    %c0_i32_1 = arith.constant 0 : i32
    return %arg0, %c0_i32, %c0_i32_0 : i32, i32, i32
  }
  func.func @transform_1(%arg0: i32) -> (i32, i32) {
    %c0_i32 = arith.constant 0 : i32
    %c0_i32_0 = arith.constant 0 : i32
    %c0_i32_1 = arith.constant 0 : i32
    return %c0_i32, %c0_i32_0 : i32, i32
  }
  func.func @transform_2(%arg0: i32) -> (i32, i32) {
    %c0_i32 = arith.constant 0 : i32
    %c0_i32_0 = arith.constant 0 : i32
    %c0_i32_1 = arith.constant 0 : i32
    return %c0_i32, %c0_i32_0 : i32, i32
  }
  func.func @transform_3(%arg0: i32) -> (i32, i32) {
    %c0_i32 = arith.constant 0 : i32
    %c0_i32_0 = arith.constant 0 : i32
    %c0_i32_1 = arith.constant 0 : i32
    return %c0_i32, %c0_i32_0 : i32, i32
  }
  func.func @transform_4(%arg0: i32) -> (i32, i32, i32) {
    %c0_i32 = arith.constant 0 : i32
    %c0_i32_0 = arith.constant 0 : i32
    %c0_i32_1 = arith.constant 0 : i32
    return %arg0, %c0_i32, %c0_i32_0 : i32, i32, i32
  }
  func.func @transform_5(%arg0: i32) -> (i32, i32, i32) {
    %c0_i32 = arith.constant 0 : i32
    %c0_i32_0 = arith.constant 0 : i32
    %c0_i32_1 = arith.constant 0 : i32
    return %arg0, %c0_i32, %c0_i32_0 : i32, i32, i32
  }
}

</mosaic_0001>

<bundles_post_ra>
// kernel: tpu_custom_call.1
= control target key start
LH: loop header
LB: loop body
LE: loop exit
PB: predicated region body
PF: predicated region fallthrough
CT: control target
= control target key end

     0   :  { %vm23_vm0 = vcmask 130048   ;;  %v2288_v0 = vmov 0.0|0.0   ;;  %v2289_v4 = vmov 0.0   ;;  %vm25_vm1 = vcmask 125952   ;;  %s2291_s28 = smov 96   ;;  %s2292_s8 = smov 32   ;;  %s2720_s2 = inlined_call_operand.vmem [shape: f32[16,48], index: 2, kind: input, shape index: {}]   ;;  %s2721_s1 = inlined_call_operand.vmem [shape: f32[16,48], index: 1, kind: input, shape index: {}]   ;;  %s2722_s3 = inlined_call_operand.vmem [shape: f32[12,48], index: 3, kind: input, shape index: {}]   ;;  %s2723_s0 = inlined_call_operand.vmem [shape: f32[8,12,48], index: 0, kind: input, shape index: {}]   ;;  %s2724_s4 = inlined_call_operand.vmem [shape: f32[8,6,16], index: 4, kind: output, shape index: {0}]   ;;  %s2725_s5 = inlined_call_operand.vmem [shape: f32[8,6,16], index: 5, kind: output, shape index: {1}]  }
   0x1   :  { %2138 = vmatprep.subr.bf16.mxu1 %v2288_v0  ;;  %2135 = vmatprep.subr.bf16.mxu0 %v2288_v0  ;;  %v29_v1 = vld [vmem:[%s2720_s2] sm:$0xff]  ;;  %v30_v2 = vld [vmem:[%s2720_s2 + $0x8] sm:$0xff]  ;;  %24 = vst.msk [vmem:[#allocation2] sm:$0xff] %vm23_vm0, %v2289_v4  ;;  %vm2290_vm2 = vmmov 0   ;;  %vm112_vm3 = vcmask 1041408   ;;  %vm191_vm4 = vcmask 1045504  }
   0x2   :  { %v27_v3 = vld [vmem:[%s2721_s1] sm:$0xff]  ;;  %v2338_v5 = vpack.c.bf16 %v30_v2, %v29_v1  ;;  %v28_v6 = vld [vmem:[%s2721_s1 + $0x8] sm:$0xff]  ;;  %2034 = vmatprep.mubr.msk.f32.mxu1 %vm2290_vm2, %v2289_v4  ;;  %2027 = vmatprep.mubr.msk.f32.mxu0 %vm2290_vm2, %v2289_v4  ;;  %26 = vst.msk [vmem:[#allocation2 + $0x8] sm:$0xf] %vm25_vm1, %v2289_v4  ;;  %s2293_s9 = smov 112   ;;  %s2294_s10 = smov 16  }
   0x3   :  { %v2349_v7 = vpack.c.bf16 %v28_v6, %v27_v3  ;;  %v2376_v18 = vld [vmem:[%s2722_s3] sm:$0xff]  ;;  %v2383_v21 = vld [vmem:[%s2722_s3 + $0x8] sm:$0xf]  ;;  %vm264_vm5 = vcmask 128000   ;;  %vm266_vm6 = vcmask 130054  }
   0x4   :  { %2140 = vmatpush3.bf16.msra.mxu1 %v2338_v5  ;;  %v33_v23 = vld [vmem:[%s2723_s0] sm:$0xff]  ;;  %v34_v25 = vld [vmem:[%s2723_s0 + $0x8] sm:$0xf] }
   0x5   :  { %2137 = vmatpush3.bf16.msra.mxu0 %v2349_v7  ;;  %2144 = vmatprep.subr.bf16.mxu1 %v2288_v0 }
   0x6   :  { %2141 = vmatprep.subr.bf16.mxu0 %v2288_v0 }
   0x8   :  { %v2355_v8 = vld [vmem:[#allocation2] sm:$0xff] }
   0x9   :  { %v2357_v9 = vld [vmem:[#allocation2 + $0x8] sm:$0xf]  ;;  %v113_v10 = vrot.slane %v2355_v8, 6  ;;  %2028 = vmatmul.mubr.msk.f32.vlgmr.msra.gmra.mrb[0].mxu0 %vm23_vm0, %v2355_v8 }
   0xa   :  { %v114_v11 = vrot.slane %v2357_v9, 6  ;;  %2143 = vmatpush3.bf16.msra.mxu0 %v2349_v7  ;;  %2041 = vmatprep.mubr.msk.f32.mxu0 %vm2290_vm2, %v2289_v4 }
   0xb   :  { %2147 = vmatprep.subr.bf16.mxu0 %v2288_v0 }
   0xc   :  { %v115_v12 = vsel %vm112_vm3, %v113_v10, %v114_v11 }
   0xd   :  { %2035 = vmatmul.mubr.msk.f32.vlgmr.msra.gmra.mrb[0].mxu1 %vm23_vm0, %v115_v12  ;;  %v1913_v12 = vld [vmem:[%s2723_s0 + $0x18] sm:$0xf] }
   0xe   :  { %2146 = vmatpush3.bf16.msra.mxu1 %v2338_v5  ;;  %2048 = vmatprep.mubr.msk.f32.mxu1 %vm2290_vm2, %v2289_v4 }
   0xf   :  { %2150 = vmatprep.subr.bf16.mxu1 %v2288_v0 }
  0xdc   :  { %v107_v13 = vpop.f32.mrb[0].mxu0 }
  0xdd   :  { %v2029_v14 = vpop.f32.mrb[1].mxu0 }
  0xe0   :  { %v184_v15 = vpop.f32.mrb[0].mxu1 }
  0xe1   :  { %v189_v16 = vrot.slane %v184_v15, 2  ;;  %v2036_v17 = vpop.f32.mrb[1].mxu1 }
  0xe3   :  { %v192_v19 = vsel %vm191_vm4, %v107_v13, %v189_v16  ;;  %v194_v22 = vadd.f32 %v189_v16, %v2383_v21  ;;  %v1912_v13 = vld [vmem:[%s2723_s0 + $0x10] sm:$0xff] }
  0xe4   :  { %v193_v20 = vadd.f32 %v192_v19, %v2376_v18 }
  0xe5   :  { %v196_v26 = vadd.f32 %v194_v22, %v34_v25 }
  0xe6   :  { %211 = vrot.lane.b32.xlu0 %v193_v20, %s2291_s28  ;;  %v195_v24 = vadd.f32 %v193_v20, %v33_v23 }
  0xe7   :  { %v1911_v28 = vmul.f32 -1.442695, %v196_v26 }
  0xe8   :  { %v1910_v27 = vmul.f32 -1.442695, %v195_v24 }
  0xea   :  { %213 = vrot.lane.b32.xlu0 %v194_v22, %s2291_s28  ;;  %2190 = vpow2.f32 %v1910_v27 }
  0xeb   :  { %2192 = vpow2.f32 %v1911_v28 }
  0xf4   :  { %v2191_v29 = vpop.eup %2190 }
  0xf5   :  { %v203_v30 = vadd.f32 1.0, %v2191_v29  ;;  %v2193_v31 = vpop.eup %2192 }
  0xf6   :  { %v204_v32 = vadd.f32 1.0, %v2193_v31 }
  0xf7   :  { %2194 = vrcp.f32 %v203_v30 }
  0xf8   :  { %2196 = vrcp.f32 %v204_v32 }
 0x101   :  { %v2195_v33 = vpop.eup %2194 }
 0x102   :  { %v2197_v36 = vpop.eup %2196  ;;  %v231_v46 = vsub.f32 1.0, %v2195_v33 }
 0x103   :  { %v232_v52 = vsub.f32 1.0, %v2197_v36 }
 0x158   :  { %v212_v34 = vpop.permute.xlu0 %211 }
 0x159   :  { %v217_v35 = vmul.f32 %v2195_v33, %v212_v34 }
 0x15b   :  { %221 = vrot.lane.b32.xlu1 %v217_v35, %s2292_s8 }
 0x15c   :  { %v214_v37 = vpop.permute.xlu0 %213 }
 0x15d   :  { %v218_v38 = vmul.f32 %v2197_v36, %v214_v37 }
 0x15f   :  { %223 = vrot.lane.b32.xlu1 %v218_v38, %s2292_s8 }
 0x1cd   :  { %v222_v39 = vpop.permute.xlu1 %221 }
 0x1ce   :  { %v227_v40 = vadd.f32 %v222_v39, %v33_v23 }
 0x1d0   :  { %2198 = vtanh.f32 %v227_v40 }
 0x1d1   :  { %v224_v41 = vpop.permute.xlu1 %223 }
 0x1d2   :  { %v228_v42 = vadd.f32 %v224_v41, %v34_v25 }
 0x1d4   :  { %2200 = vtanh.f32 %v228_v42 }
 0x1da   :  { %v2199_v43 = vpop.eup %2198 }
 0x1db   :  { %235 = vrot.lane.b32.xlu0 %v2199_v43, %s2293_s9 }
 0x1de   :  { %v2201_v44 = vpop.eup %2200 }
 0x1df   :  { %243 = vrot.lane.b32.xlu0 %v2355_v8, %s2294_s10  ;;  %237 = vrot.lane.b32.xlu1 %v2201_v44, %s2293_s9 }
 0x1e3   :  { %245 = vrot.lane.b32.xlu1 %v2357_v9, %s2294_s10 }
 0x24d   :  { %v236_v45 = vpop.permute.xlu0 %235 }
 0x24e   :  { %v241_v49 = vmul.f32 %v236_v45, %v231_v46 }
 0x251   :  { %v244_v47 = vpop.permute.xlu0 %243  ;;  %v238_v48 = vpop.permute.xlu1 %237 }
 0x252   :  { %v249_v50 = vmul.f32 %v2195_v33, %v244_v47  ;;  %v242_v54 = vmul.f32 %v238_v48, %v232_v52 }
 0x254   :  { %v251_v51 = vadd.f32 %v249_v50, %v241_v49 }
 0x255   :  { %v246_v53 = vpop.permute.xlu1 %245 }
 0x256   :  { %v250_v55 = vmul.f32 %v2197_v36, %v246_v53  ;;  %255 = vrot.lane.b32.xlu0 %v251_v51, %s2293_s9 }
 0x258   :  { %v252_v56 = vadd.f32 %v250_v55, %v242_v54 }
 0x25a   :  { %257 = vrot.lane.b32.xlu1 %v252_v56, %s2293_s9 }
 0x2c8   :  { %v256_v57 = vpop.permute.xlu0 %255 }
 0x2c9   :  { %261 = vst.msk [vmem:[#allocation2] sm:$0xff] %vm23_vm0, %v256_v57 }
 0x2ca   :  { %265 = vst.msk [vmem:[%s2724_s4] sm:$0x3f] %vm264_vm5, %v256_v57 }
 0x2cb   :  { %267 = vst.msk [vmem:[%s2725_s5 - $0x6] sm:$0xc0] %vm266_vm6, %v256_v57 }
 0x2cc   :  { %v258_v58 = vpop.permute.xlu1 %257 }
 0x2cd   :  { %263 = vst.msk [vmem:[#allocation2 + $0x8] sm:$0xf] %vm25_vm1, %v258_v58  ;;  %268 = vst.msk [vmem:[%s2725_s5 + $0x2] sm:$0xf] %vm25_vm1, %v258_v58 }
 0x2d0   :  { %v272_v59 = vld [vmem:[#allocation2] sm:$0xff] }
 0x2d1   :  { %2042 = vmatmul.mubr.msk.f32.vlgmr.msra.gmra.mrb[2].mxu0 %vm23_vm0, %v272_v59  ;;  %v348_v61 = vrot.slane %v272_v59, 6 }
 0x2d2   :  { %2149 = vmatpush3.bf16.msra.mxu0 %v2349_v7  ;;  %2055 = vmatprep.mubr.msk.f32.mxu0 %vm2290_vm2, %v2289_v4 }
 0x2d3   :  { %2153 = vmatprep.subr.bf16.mxu0 %v2288_v0 }
 0x2d4   :  { %v273_v60 = vld [vmem:[#allocation2 + $0x8] sm:$0xf] }
 0x2d5   :  { %v349_v62 = vrot.slane %v273_v60, 6 }
 0x2d7   :  { %v350_v63 = vsel %vm112_vm3, %v348_v61, %v349_v62 }
 0x2d8   :  { %2049 = vmatmul.mubr.msk.f32.vlgmr.msra.gmra.mrb[2].mxu1 %vm23_vm0, %v350_v63  ;;  %v1922_v63 = vld [vmem:[%s2723_s0 + $0x28] sm:$0xf] }
 0x2d9   :  { %2152 = vmatpush3.bf16.msra.mxu1 %v2338_v5  ;;  %2062 = vmatprep.mubr.msk.f32.mxu1 %vm2290_vm2, %v2289_v4 }
 0x2da   :  { %2156 = vmatprep.subr.bf16.mxu1 %v2288_v0 }
 0x3a4   :  { %v343_v1 = vpop.f32.mrb[2].mxu0 }
 0x3a5   :  { %v2043_v2 = vpop.f32.mrb[3].mxu0 }
 0x3ab   :  { %v419_v3 = vpop.f32.mrb[2].mxu1 }
 0x3ac   :  { %v424_v6 = vrot.slane %v419_v3, 2  ;;  %v2050_v8 = vpop.f32.mrb[3].mxu1 }
 0x3ae   :  { %v428_v9 = vadd.f32 %v424_v6, %v2383_v21  ;;  %v426_v10 = vsel %vm191_vm4, %v343_v1, %v424_v6  ;;  %v1921_v1 = vld [vmem:[%s2723_s0 + $0x20] sm:$0xff] }
 0x3af   :  { %v427_v11 = vadd.f32 %v426_v10, %v2376_v18 }
 0x3b0   :  { %447 = vrot.lane.b32.xlu1 %v428_v9, %s2291_s28  ;;  %v430_v14 = vadd.f32 %v1913_v12, %v428_v9 }
 0x3b1   :  { %445 = vrot.lane.b32.xlu0 %v427_v11, %s2291_s28  ;;  %v429_v15 = vadd.f32 %v1912_v13, %v427_v11 }
 0x3b2   :  { %v1917_v16 = vmul.f32 -1.442695, %v430_v14 }
 0x3b3   :  { %v1916_v17 = vmul.f32 -1.442695, %v429_v15 }
 0x3b4   :  { %2202 = vpow2.f32 %v1917_v16 }
 0x3b5   :  { %2204 = vpow2.f32 %v1916_v17 }
 0x3be   :  { %v2203_v19 = vpop.eup %2202 }
 0x3bf   :  { %v2205_v20 = vpop.eup %2204  ;;  %v438_v22 = vadd.f32 1.0, %v2203_v19 }
 0x3c0   :  { %v437_v23 = vadd.f32 1.0, %v2205_v20 }
 0x3c1   :  { %2206 = vrcp.f32 %v438_v22 }
 0x3c2   :  { %2208 = vrcp.f32 %v437_v23 }
 0x3cb   :  { %v2207_v24 = vpop.eup %2206 }
 0x3cc   :  { %v2209_v26 = vpop.eup %2208  ;;  %v466_v38 = vsub.f32 1.0, %v2207_v24 }
 0x3cd   :  { %v465_v39 = vsub.f32 1.0, %v2209_v26 }
 0x422   :  { %v448_v25 = vpop.permute.xlu1 %447 }
 0x423   :  { %v452_v27 = vmul.f32 %v2207_v24, %v448_v25  ;;  %v446_v28 = vpop.permute.xlu0 %445 }
 0x424   :  { %v451_v29 = vmul.f32 %v2209_v26, %v446_v28 }
 0x425   :  { %457 = vrot.lane.b32.xlu1 %v452_v27, %s2292_s8 }
 0x426   :  { %455 = vrot.lane.b32.xlu0 %v451_v29, %s2292_s8 }
 0x497   :  { %v458_v30 = vpop.permute.xlu1 %457 }
 0x498   :  { %v462_v31 = vadd.f32 %v1913_v12, %v458_v30  ;;  %v456_v32 = vpop.permute.xlu0 %455 }
 0x499   :  { %v461_v33 = vadd.f32 %v1912_v13, %v456_v32 }
 0x49a   :  { %2210 = vtanh.f32 %v462_v31 }
 0x49b   :  { %2212 = vtanh.f32 %v461_v33 }
 0x4a4   :  { %v2211_v34 = vpop.eup %2210 }
 0x4a5   :  { %v2213_v35 = vpop.eup %2212  ;;  %471 = vrot.lane.b32.xlu1 %v2211_v34, %s2293_s9 }
 0x4a6   :  { %469 = vrot.lane.b32.xlu0 %v2213_v35, %s2293_s9 }
 0x4a9   :  { %479 = vrot.lane.b32.xlu1 %v273_v60, %s2294_s10 }
 0x4aa   :  { %477 = vrot.lane.b32.xlu0 %v272_v59, %s2294_s10 }
 0x517   :  { %v472_v36 = vpop.permute.xlu1 %471 }
 0x518   :  { %v470_v37 = vpop.permute.xlu0 %469  ;;  %v476_v41 = vmul.f32 %v472_v36, %v466_v38 }
 0x519   :  { %v475_v44 = vmul.f32 %v470_v37, %v465_v39 }
 0x51b   :  { %v480_v40 = vpop.permute.xlu1 %479 }
 0x51c   :  { %v484_v42 = vmul.f32 %v2207_v24, %v480_v40  ;;  %v478_v43 = vpop.permute.xlu0 %477 }
 0x51d   :  { %v483_v45 = vmul.f32 %v2209_v26, %v478_v43 }
 0x51e   :  { %v486_v46 = vadd.f32 %v484_v42, %v476_v41 }
 0x51f   :  { %v485_v47 = vadd.f32 %v483_v45, %v475_v44 }
 0x520   :  { %491 = vrot.lane.b32.xlu1 %v486_v46, %s2293_s9 }
 0x521   :  { %489 = vrot.lane.b32.xlu0 %v485_v47, %s2293_s9 }
 0x592   :  { %v492_v48 = vpop.permute.xlu1 %491 }
 0x593   :  { %496 = vst.msk [vmem:[#allocation2 + $0x8] sm:$0xf] %vm25_vm1, %v492_v48  ;;  %1920 = vst.msk [vmem:[%s2725_s5 + $0xa] sm:$0xf] %vm25_vm1, %v492_v48  ;;  %v490_v49 = vpop.permute.xlu0 %489 }
 0x594   :  { %495 = vst.msk [vmem:[#allocation2] sm:$0xff] %vm23_vm0, %v490_v49 }
 0x595   :  { %1918 = vst.msk [vmem:[%s2724_s4 + $0x8] sm:$0x3f] %vm264_vm5, %v490_v49 }
 0x596   :  { %1919 = vst.msk [vmem:[%s2725_s5 + $0x2] sm:$0xc0] %vm266_vm6, %v490_v49 }
 0x59a   :  { %v506_v50 = vld [vmem:[#allocation2 + $0x8] sm:$0xf] }
 0x59b   :  { %v505_v51 = vld [vmem:[#allocation2] sm:$0xff]  ;;  %v582_v52 = vrot.slane %v506_v50, 6 }
 0x59c   :  { %2056 = vmatmul.mubr.msk.f32.vlgmr.msra.gmra.mrb[4].mxu0 %vm23_vm0, %v505_v51  ;;  %v581_v53 = vrot.slane %v505_v51, 6 }
 0x59d   :  { %2155 = vmatpush3.bf16.msra.mxu0 %v2349_v7  ;;  %2069 = vmatprep.mubr.msk.f32.mxu0 %vm2290_vm2, %v2289_v4 }
 0x59e   :  { %v583_v54 = vsel %vm112_vm3, %v581_v53, %v582_v52  ;;  %2159 = vmatprep.subr.bf16.mxu0 %v2288_v0 }
 0x59f   :  { %2063 = vmatmul.mubr.msk.f32.vlgmr.msra.gmra.mrb[4].mxu1 %vm23_vm0, %v583_v54  ;;  %v1931_v54 = vld [vmem:[%s2723_s0 + $0x38] sm:$0xf] }
 0x5a0   :  { %2158 = vmatpush3.bf16.msra.mxu1 %v2338_v5  ;;  %2076 = vmatprep.mubr.msk.f32.mxu1 %vm2290_vm2, %v2289_v4 }
 0x5a1   :  { %2162 = vmatprep.subr.bf16.mxu1 %v2288_v0 }
 0x66f   :  { %v576_v55 = vpop.f32.mrb[4].mxu0 }
 0x670   :  { %v2057_v56 = vpop.f32.mrb[5].mxu0 }
 0x672   :  { %v652_v57 = vpop.f32.mrb[4].mxu1 }
 0x673   :  { %v657_v58 = vrot.slane %v652_v57, 2  ;;  %v2064_v59 = vpop.f32.mrb[5].mxu1 }
 0x675   :  { %v661_v60 = vadd.f32 %v657_v58, %v2383_v21  ;;  %v659_v61 = vsel %vm191_vm4, %v576_v55, %v657_v58  ;;  %v1930_v55 = vld [vmem:[%s2723_s0 + $0x30] sm:$0xff] }
 0x676   :  { %v660_v62 = vadd.f32 %v659_v61, %v2376_v18 }
 0x677   :  { %680 = vrot.lane.b32.xlu1 %v661_v60, %s2291_s28  ;;  %v663_v2 = vadd.f32 %v1922_v63, %v661_v60 }
 0x678   :  { %678 = vrot.lane.b32.xlu0 %v660_v62, %s2291_s28  ;;  %v662_v3 = vadd.f32 %v1921_v1, %v660_v62 }
 0x679   :  { %v1926_v6 = vmul.f32 -1.442695, %v663_v2 }
 0x67a   :  { %v1925_v8 = vmul.f32 -1.442695, %v662_v3 }
 0x67b   :  { %2214 = vpow2.f32 %v1926_v6 }
 0x67c   :  { %2216 = vpow2.f32 %v1925_v8 }
 0x685   :  { %v2215_v9 = vpop.eup %2214 }
 0x686   :  { %v2217_v10 = vpop.eup %2216  ;;  %v671_v11 = vadd.f32 1.0, %v2215_v9 }
 0x687   :  { %v670_v12 = vadd.f32 1.0, %v2217_v10 }
 0x688   :  { %2218 = vrcp.f32 %v671_v11 }
 0x689   :  { %2220 = vrcp.f32 %v670_v12 }
 0x692   :  { %v2219_v13 = vpop.eup %2218 }
 0x693   :  { %v2221_v15 = vpop.eup %2220  ;;  %v699_v29 = vsub.f32 1.0, %v2219_v13 }
 0x694   :  { %v698_v30 = vsub.f32 1.0, %v2221_v15 }
 0x6e9   :  { %v681_v14 = vpop.permute.xlu1 %680 }
 0x6ea   :  { %v685_v16 = vmul.f32 %v2219_v13, %v681_v14  ;;  %v679_v17 = vpop.permute.xlu0 %678 }
 0x6eb   :  { %v684_v19 = vmul.f32 %v2221_v15, %v679_v17 }
 0x6ec   :  { %690 = vrot.lane.b32.xlu1 %v685_v16, %s2292_s8 }
 0x6ed   :  { %688 = vrot.lane.b32.xlu0 %v684_v19, %s2292_s8 }
 0x75e   :  { %v691_v20 = vpop.permute.xlu1 %690 }
 0x75f   :  { %v695_v22 = vadd.f32 %v1922_v63, %v691_v20  ;;  %v689_v23 = vpop.permute.xlu0 %688 }
 0x760   :  { %v694_v24 = vadd.f32 %v1921_v1, %v689_v23 }
 0x761   :  { %2222 = vtanh.f32 %v695_v22 }
 0x762   :  { %2224 = vtanh.f32 %v694_v24 }
 0x76b   :  { %v2223_v25 = vpop.eup %2222 }
 0x76c   :  { %v2225_v26 = vpop.eup %2224  ;;  %704 = vrot.lane.b32.xlu1 %v2223_v25, %s2293_s9 }
 0x76d   :  { %702 = vrot.lane.b32.xlu0 %v2225_v26, %s2293_s9 }
 0x770   :  { %712 = vrot.lane.b32.xlu1 %v506_v50, %s2294_s10 }
 0x771   :  { %710 = vrot.lane.b32.xlu0 %v505_v51, %s2294_s10 }
 0x7de   :  { %v705_v27 = vpop.permute.xlu1 %704 }
 0x7df   :  { %v703_v28 = vpop.permute.xlu0 %702  ;;  %v709_v32 = vmul.f32 %v705_v27, %v699_v29 }
 0x7e0   :  { %v708_v35 = vmul.f32 %v703_v28, %v698_v30 }
 0x7e2   :  { %v713_v31 = vpop.permute.xlu1 %712 }
 0x7e3   :  { %v717_v33 = vmul.f32 %v2219_v13, %v713_v31  ;;  %v711_v34 = vpop.permute.xlu0 %710 }
 0x7e4   :  { %v716_v36 = vmul.f32 %v2221_v15, %v711_v34 }
 0x7e5   :  { %v719_v37 = vadd.f32 %v717_v33, %v709_v32 }
 0x7e6   :  { %v718_v38 = vadd.f32 %v716_v36, %v708_v35 }
 0x7e7   :  { %724 = vrot.lane.b32.xlu1 %v719_v37, %s2293_s9 }
 0x7e8   :  { %722 = vrot.lane.b32.xlu0 %v718_v38, %s2293_s9 }
 0x859   :  { %v725_v39 = vpop.permute.xlu1 %724 }
 0x85a   :  { %729 = vst.msk [vmem:[#allocation2 + $0x8] sm:$0xf] %vm25_vm1, %v725_v39  ;;  %1929 = vst.msk [vmem:[%s2725_s5 + $0x12] sm:$0xf] %vm25_vm1, %v725_v39  ;;  %v723_v40 = vpop.permute.xlu0 %722 }
 0x85b   :  { %728 = vst.msk [vmem:[#allocation2] sm:$0xff] %vm23_vm0, %v723_v40 }
 0x85c   :  { %1927 = vst.msk [vmem:[%s2724_s4 + $0x10] sm:$0x3f] %vm264_vm5, %v723_v40 }
 0x85d   :  { %1928 = vst.msk [vmem:[%s2725_s5 + $0xa] sm:$0xc0] %vm266_vm6, %v723_v40 }
 0x861   :  { %v739_v41 = vld [vmem:[#allocation2 + $0x8] sm:$0xf] }
 0x862   :  { %v738_v42 = vld [vmem:[#allocation2] sm:$0xff]  ;;  %v815_v43 = vrot.slane %v739_v41, 6 }
 0x863   :  { %2070 = vmatmul.mubr.msk.f32.vlgmr.msra.gmra.mrb[6].mxu0 %vm23_vm0, %v738_v42  ;;  %v814_v44 = vrot.slane %v738_v42, 6 }
 0x864   :  { %2161 = vmatpush3.bf16.msra.mxu0 %v2349_v7  ;;  %2083 = vmatprep.mubr.msk.f32.mxu0 %vm2290_vm2, %v2289_v4 }
 0x865   :  { %v816_v45 = vsel %vm112_vm3, %v814_v44, %v815_v43  ;;  %2165 = vmatprep.subr.bf16.mxu0 %v2288_v0 }
 0x866   :  { %2077 = vmatmul.mubr.msk.f32.vlgmr.msra.gmra.mrb[6].mxu1 %vm23_vm0, %v816_v45  ;;  %v1940_v45 = vld [vmem:[%s2723_s0 + $0x48] sm:$0xf] }
 0x867   :  { %2164 = vmatpush3.bf16.msra.mxu1 %v2338_v5  ;;  %2090 = vmatprep.mubr.msk.f32.mxu1 %vm2290_vm2, %v2289_v4 }
 0x868   :  { %2168 = vmatprep.subr.bf16.mxu1 %v2288_v0 }
 0x936   :  { %v809_v46 = vpop.f32.mrb[6].mxu0 }
 0x937   :  { %v2071_v47 = vpop.f32.mrb[7].mxu0 }
 0x939   :  { %v885_v48 = vpop.f32.mrb[6].mxu1 }
 0x93a   :  { %v890_v49 = vrot.slane %v885_v48, 2  ;;  %v2078_v50 = vpop.f32.mrb[7].mxu1 }
 0x93c   :  { %v894_v51 = vadd.f32 %v890_v49, %v2383_v21  ;;  %v892_v52 = vsel %vm191_vm4, %v809_v46, %v890_v49  ;;  %v1939_v46 = vld [vmem:[%s2723_s0 + $0x40] sm:$0xff] }
 0x93d   :  { %v893_v53 = vadd.f32 %v892_v52, %v2376_v18 }
 0x93e   :  { %913 = vrot.lane.b32.xlu1 %v894_v51, %s2291_s28  ;;  %v896_v56 = vadd.f32 %v1931_v54, %v894_v51 }
 0x93f   :  { %911 = vrot.lane.b32.xlu0 %v893_v53, %s2291_s28  ;;  %v895_v57 = vadd.f32 %v1930_v55, %v893_v53 }
 0x940   :  { %v1935_v58 = vmul.f32 -1.442695, %v896_v56 }
 0x941   :  { %v1934_v59 = vmul.f32 -1.442695, %v895_v57 }
 0x942   :  { %2226 = vpow2.f32 %v1935_v58 }
 0x943   :  { %2228 = vpow2.f32 %v1934_v59 }
 0x94c   :  { %v2227_v60 = vpop.eup %2226 }
 0x94d   :  { %v2229_v61 = vpop.eup %2228  ;;  %v904_v62 = vadd.f32 1.0, %v2227_v60 }
 0x94e   :  { %v903_v63 = vadd.f32 1.0, %v2229_v61 }
 0x94f   :  { %2230 = vrcp.f32 %v904_v62 }
 0x950   :  { %2232 = vrcp.f32 %v903_v63 }
 0x959   :  { %v2231_v1 = vpop.eup %2230 }
 0x95a   :  { %v2233_v3 = vpop.eup %2232  ;;  %v932_v19 = vsub.f32 1.0, %v2231_v1 }
 0x95b   :  { %v931_v20 = vsub.f32 1.0, %v2233_v3 }
 0x9b0   :  { %v914_v2 = vpop.permute.xlu1 %913 }
 0x9b1   :  { %v918_v6 = vmul.f32 %v2231_v1, %v914_v2  ;;  %v912_v8 = vpop.permute.xlu0 %911 }
 0x9b2   :  { %v917_v9 = vmul.f32 %v2233_v3, %v912_v8 }
 0x9b3   :  { %923 = vrot.lane.b32.xlu1 %v918_v6, %s2292_s8 }
 0x9b4   :  { %921 = vrot.lane.b32.xlu0 %v917_v9, %s2292_s8 }
 0xa25   :  { %v924_v10 = vpop.permute.xlu1 %923 }
 0xa26   :  { %v928_v11 = vadd.f32 %v1931_v54, %v924_v10  ;;  %v922_v12 = vpop.permute.xlu0 %921 }
 0xa27   :  { %v927_v13 = vadd.f32 %v1930_v55, %v922_v12 }
 0xa28   :  { %2234 = vtanh.f32 %v928_v11 }
 0xa29   :  { %2236 = vtanh.f32 %v927_v13 }
 0xa32   :  { %v2235_v14 = vpop.eup %2234 }
 0xa33   :  { %v2237_v15 = vpop.eup %2236  ;;  %937 = vrot.lane.b32.xlu1 %v2235_v14, %s2293_s9 }
 0xa34   :  { %935 = vrot.lane.b32.xlu0 %v2237_v15, %s2293_s9 }
 0xa37   :  { %945 = vrot.lane.b32.xlu1 %v739_v41, %s2294_s10 }
 0xa38   :  { %943 = vrot.lane.b32.xlu0 %v738_v42, %s2294_s10 }
 0xaa5   :  { %v938_v16 = vpop.permute.xlu1 %937 }
 0xaa6   :  { %v936_v17 = vpop.permute.xlu0 %935  ;;  %v942_v23 = vmul.f32 %v938_v16, %v932_v19 }
 0xaa7   :  { %v941_v26 = vmul.f32 %v936_v17, %v931_v20 }
 0xaa9   :  { %v946_v22 = vpop.permute.xlu1 %945 }
 0xaaa   :  { %v950_v24 = vmul.f32 %v2231_v1, %v946_v22  ;;  %v944_v25 = vpop.permute.xlu0 %943 }
 0xaab   :  { %v949_v27 = vmul.f32 %v2233_v3, %v944_v25 }
 0xaac   :  { %v952_v28 = vadd.f32 %v950_v24, %v942_v23 }
 0xaad   :  { %v951_v29 = vadd.f32 %v949_v27, %v941_v26 }
 0xaae   :  { %957 = vrot.lane.b32.xlu1 %v952_v28, %s2293_s9 }
 0xaaf   :  { %955 = vrot.lane.b32.xlu0 %v951_v29, %s2293_s9 }
 0xb20   :  { %v958_v30 = vpop.permute.xlu1 %957 }
 0xb21   :  { %962 = vst.msk [vmem:[#allocation2 + $0x8] sm:$0xf] %vm25_vm1, %v958_v30  ;;  %1938 = vst.msk [vmem:[%s2725_s5 + $0x1a] sm:$0xf] %vm25_vm1, %v958_v30  ;;  %v956_v31 = vpop.permute.xlu0 %955 }
 0xb22   :  { %961 = vst.msk [vmem:[#allocation2] sm:$0xff] %vm23_vm0, %v956_v31 }
 0xb23   :  { %1936 = vst.msk [vmem:[%s2724_s4 + $0x18] sm:$0x3f] %vm264_vm5, %v956_v31 }
 0xb24   :  { %1937 = vst.msk [vmem:[%s2725_s5 + $0x12] sm:$0xc0] %vm266_vm6, %v956_v31 }
 0xb28   :  { %v972_v32 = vld [vmem:[#allocation2 + $0x8] sm:$0xf] }
 0xb29   :  { %v971_v33 = vld [vmem:[#allocation2] sm:$0xff]  ;;  %v1048_v34 = vrot.slane %v972_v32, 6 }
 0xb2a   :  { %2084 = vmatmul.mubr.msk.f32.vlgmr.msra.gmra.mrb[8].mxu0 %vm23_vm0, %v971_v33  ;;  %v1047_v35 = vrot.slane %v971_v33, 6 }
 0xb2b   :  { %2167 = vmatpush3.bf16.msra.mxu0 %v2349_v7  ;;  %2097 = vmatprep.mubr.msk.f32.mxu0 %vm2290_vm2, %v2289_v4 }
 0xb2c   :  { %v1049_v36 = vsel %vm112_vm3, %v1047_v35, %v1048_v34  ;;  %2171 = vmatprep.subr.bf16.mxu0 %v2288_v0 }
 0xb2d   :  { %2091 = vmatmul.mubr.msk.f32.vlgmr.msra.gmra.mrb[8].mxu1 %vm23_vm0, %v1049_v36  ;;  %v1949_v36 = vld [vmem:[%s2723_s0 + $0x58] sm:$0xf] }
 0xb2e   :  { %2170 = vmatpush3.bf16.msra.mxu1 %v2338_v5  ;;  %2104 = vmatprep.mubr.msk.f32.mxu1 %vm2290_vm2, %v2289_v4 }
 0xb2f   :  { %2174 = vmatprep.subr.bf16.mxu1 %v2288_v0 }
 0xbfd   :  { %v1042_v37 = vpop.f32.mrb[8].mxu0 }
 0xbfe   :  { %v2085_v38 = vpop.f32.mrb[9].mxu0 }
 0xc00   :  { %v1118_v39 = vpop.f32.mrb[8].mxu1 }
 0xc01   :  { %v1123_v40 = vrot.slane %v1118_v39, 2  ;;  %v2092_v41 = vpop.f32.mrb[9].mxu1 }
 0xc03   :  { %v1127_v42 = vadd.f32 %v1123_v40, %v2383_v21  ;;  %v1125_v43 = vsel %vm191_vm4, %v1042_v37, %v1123_v40 }
 0xc04   :  { %v1126_v44 = vadd.f32 %v1125_v43, %v2376_v18 }
 0xc05   :  { %1146 = vrot.lane.b32.xlu1 %v1127_v42, %s2291_s28  ;;  %v1129_v47 = vadd.f32 %v1940_v45, %v1127_v42 }
 0xc06   :  { %1144 = vrot.lane.b32.xlu0 %v1126_v44, %s2291_s28  ;;  %v1128_v48 = vadd.f32 %v1939_v46, %v1126_v44 }
 0xc07   :  { %v1944_v49 = vmul.f32 -1.442695, %v1129_v47 }
 0xc08   :  { %v1943_v50 = vmul.f32 -1.442695, %v1128_v48 }
 0xc09   :  { %2238 = vpow2.f32 %v1944_v49 }
 0xc0a   :  { %2240 = vpow2.f32 %v1943_v50 }
 0xc13   :  { %v2239_v51 = vpop.eup %2238 }
 0xc14   :  { %v2241_v52 = vpop.eup %2240  ;;  %v1137_v53 = vadd.f32 1.0, %v2239_v51 }
 0xc15   :  { %v1136_v54 = vadd.f32 1.0, %v2241_v52 }
 0xc16   :  { %2242 = vrcp.f32 %v1137_v53 }
 0xc17   :  { %2244 = vrcp.f32 %v1136_v54 }
 0xc20   :  { %v2243_v55 = vpop.eup %2242 }
 0xc21   :  { %v2245_v57 = vpop.eup %2244  ;;  %v1165_v9 = vsub.f32 1.0, %v2243_v55 }
 0xc22   :  { %v1164_v10 = vsub.f32 1.0, %v2245_v57 }
 0xc77   :  { %v1147_v56 = vpop.permute.xlu1 %1146 }
 0xc78   :  { %v1151_v58 = vmul.f32 %v2243_v55, %v1147_v56  ;;  %v1145_v59 = vpop.permute.xlu0 %1144 }
 0xc79   :  { %v1150_v60 = vmul.f32 %v2245_v57, %v1145_v59 }
 0xc7a   :  { %1156 = vrot.lane.b32.xlu1 %v1151_v58, %s2292_s8 }
 0xc7b   :  { %1154 = vrot.lane.b32.xlu0 %v1150_v60, %s2292_s8 }
 0xcec   :  { %v1157_v61 = vpop.permute.xlu1 %1156 }
 0xced   :  { %v1161_v62 = vadd.f32 %v1940_v45, %v1157_v61  ;;  %v1155_v63 = vpop.permute.xlu0 %1154 }
 0xcee   :  { %v1160_v1 = vadd.f32 %v1939_v46, %v1155_v63 }
 0xcef   :  { %2246 = vtanh.f32 %v1161_v62 }
 0xcf0   :  { %2248 = vtanh.f32 %v1160_v1 }
 0xcf9   :  { %v2247_v2 = vpop.eup %2246 }
 0xcfa   :  { %v2249_v3 = vpop.eup %2248  ;;  %1170 = vrot.lane.b32.xlu1 %v2247_v2, %s2293_s9 }
 0xcfb   :  { %1168 = vrot.lane.b32.xlu0 %v2249_v3, %s2293_s9 }
 0xcfe   :  { %1178 = vrot.lane.b32.xlu1 %v972_v32, %s2294_s10 }
 0xcff   :  { %1176 = vrot.lane.b32.xlu0 %v971_v33, %s2294_s10 }
 0xd6c   :  { %v1171_v6 = vpop.permute.xlu1 %1170 }
 0xd6d   :  { %v1169_v8 = vpop.permute.xlu0 %1168  ;;  %v1175_v12 = vmul.f32 %v1171_v6, %v1165_v9 }
 0xd6e   :  { %v1174_v15 = vmul.f32 %v1169_v8, %v1164_v10 }
 0xd70   :  { %v1179_v11 = vpop.permute.xlu1 %1178 }
 0xd71   :  { %v1183_v13 = vmul.f32 %v2243_v55, %v1179_v11  ;;  %v1177_v14 = vpop.permute.xlu0 %1176 }
 0xd72   :  { %v1182_v16 = vmul.f32 %v2245_v57, %v1177_v14 }
 0xd73   :  { %v1185_v17 = vadd.f32 %v1183_v13, %v1175_v12 }
 0xd74   :  { %v1184_v19 = vadd.f32 %v1182_v16, %v1174_v15 }
 0xd75   :  { %1190 = vrot.lane.b32.xlu1 %v1185_v17, %s2293_s9 }
 0xd76   :  { %1188 = vrot.lane.b32.xlu0 %v1184_v19, %s2293_s9 }
 0xde7   :  { %v1191_v20 = vpop.permute.xlu1 %1190 }
 0xde8   :  { %1195 = vst.msk [vmem:[#allocation2 + $0x8] sm:$0xf] %vm25_vm1, %v1191_v20  ;;  %1947 = vst.msk [vmem:[%s2725_s5 + $0x22] sm:$0xf] %vm25_vm1, %v1191_v20  ;;  %v1189_v22 = vpop.permute.xlu0 %1188 }
 0xde9   :  { %1194 = vst.msk [vmem:[#allocation2] sm:$0xff] %vm23_vm0, %v1189_v22 }
 0xdea   :  { %1945 = vst.msk [vmem:[%s2724_s4 + $0x20] sm:$0x3f] %vm264_vm5, %v1189_v22 }
 0xdeb   :  { %1946 = vst.msk [vmem:[%s2725_s5 + $0x1a] sm:$0xc0] %vm266_vm6, %v1189_v22 }
 0xdef   :  { %v1205_v23 = vld [vmem:[#allocation2 + $0x8] sm:$0xf] }
 0xdf0   :  { %v1204_v24 = vld [vmem:[#allocation2] sm:$0xff]  ;;  %v1281_v25 = vrot.slane %v1205_v23, 6 }
 0xdf1   :  { %2098 = vmatmul.mubr.msk.f32.vlgmr.msra.gmra.mrb[10].mxu0 %vm23_vm0, %v1204_v24  ;;  %v1280_v26 = vrot.slane %v1204_v24, 6 }
 0xdf2   :  { %2173 = vmatpush3.bf16.msra.mxu0 %v2349_v7  ;;  %2111 = vmatprep.mubr.msk.f32.mxu0 %vm2290_vm2, %v2289_v4 }
 0xdf3   :  { %v1282_v27 = vsel %vm112_vm3, %v1280_v26, %v1281_v25  ;;  %2177 = vmatprep.subr.bf16.mxu0 %v2288_v0 }
 0xdf4   :  { %2105 = vmatmul.mubr.msk.f32.vlgmr.msra.gmra.mrb[10].mxu1 %vm23_vm0, %v1282_v27 }
 0xdf5   :  { %2176 = vmatpush3.bf16.msra.mxu1 %v2338_v5  ;;  %2118 = vmatprep.mubr.msk.f32.mxu1 %vm2290_vm2, %v2289_v4 }
 0xdf6   :  { %2180 = vmatprep.subr.bf16.mxu1 %v2288_v0  ;;  %v1948_v0 = vld [vmem:[%s2723_s0 + $0x50] sm:$0xff] }
 0xec4   :  { %v1275_v28 = vpop.f32.mrb[10].mxu0 }
 0xec5   :  { %v2099_v29 = vpop.f32.mrb[11].mxu0 }
 0xec7   :  { %v1351_v30 = vpop.f32.mrb[10].mxu1 }
 0xec8   :  { %v1356_v31 = vrot.slane %v1351_v30, 2  ;;  %v2106_v32 = vpop.f32.mrb[11].mxu1 }
 0xeca   :  { %v1360_v33 = vadd.f32 %v1356_v31, %v2383_v21  ;;  %v1358_v34 = vsel %vm191_vm4, %v1275_v28, %v1356_v31 }
 0xecb   :  { %v1359_v35 = vadd.f32 %v1358_v34, %v2376_v18 }
 0xecc   :  { %1379 = vrot.lane.b32.xlu1 %v1360_v33, %s2291_s28  ;;  %v1362_v37 = vadd.f32 %v1949_v36, %v1360_v33 }
 0xecd   :  { %1377 = vrot.lane.b32.xlu0 %v1359_v35, %s2291_s28  ;;  %v1361_v38 = vadd.f32 %v1948_v0, %v1359_v35 }
 0xece   :  { %v1953_v39 = vmul.f32 -1.442695, %v1362_v37 }
 0xecf   :  { %v1952_v40 = vmul.f32 -1.442695, %v1361_v38 }
 0xed0   :  { %2250 = vpow2.f32 %v1953_v39 }
 0xed1   :  { %2252 = vpow2.f32 %v1952_v40 }
 0xeda   :  { %v2251_v41 = vpop.eup %2250 }
 0xedb   :  { %v2253_v42 = vpop.eup %2252  ;;  %v1370_v43 = vadd.f32 1.0, %v2251_v41 }
 0xedc   :  { %v1369_v44 = vadd.f32 1.0, %v2253_v42 }
 0xedd   :  { %2254 = vrcp.f32 %v1370_v43 }
 0xede   :  { %2256 = vrcp.f32 %v1369_v44 }
 0xee7   :  { %v2255_v45 = vpop.eup %2254 }
 0xee8   :  { %v2257_v47 = vpop.eup %2256  ;;  %v1398_v59 = vsub.f32 1.0, %v2255_v45 }
 0xee9   :  { %v1397_v60 = vsub.f32 1.0, %v2257_v47 }
 0xf3e   :  { %v1380_v46 = vpop.permute.xlu1 %1379 }
 0xf3f   :  { %v1384_v48 = vmul.f32 %v2255_v45, %v1380_v46  ;;  %v1378_v49 = vpop.permute.xlu0 %1377 }
 0xf40   :  { %v1383_v50 = vmul.f32 %v2257_v47, %v1378_v49 }
 0xf41   :  { %1389 = vrot.lane.b32.xlu1 %v1384_v48, %s2292_s8 }
 0xf42   :  { %1387 = vrot.lane.b32.xlu0 %v1383_v50, %s2292_s8 }
 0xfb3   :  { %v1390_v51 = vpop.permute.xlu1 %1389 }
 0xfb4   :  { %v1394_v52 = vadd.f32 %v1949_v36, %v1390_v51  ;;  %v1388_v53 = vpop.permute.xlu0 %1387 }
 0xfb5   :  { %v1393_v54 = vadd.f32 %v1948_v0, %v1388_v53 }
 0xfb6   :  { %2258 = vtanh.f32 %v1394_v52 }
 0xfb7   :  { %2260 = vtanh.f32 %v1393_v54 }
 0xfc0   :  { %v2259_v55 = vpop.eup %2258 }
 0xfc1   :  { %v2261_v56 = vpop.eup %2260  ;;  %1403 = vrot.lane.b32.xlu1 %v2259_v55, %s2293_s9 }
 0xfc2   :  { %1401 = vrot.lane.b32.xlu0 %v2261_v56, %s2293_s9 }
 0xfc5   :  { %1411 = vrot.lane.b32.xlu1 %v1205_v23, %s2294_s10 }
 0xfc6   :  { %1409 = vrot.lane.b32.xlu0 %v1204_v24, %s2294_s10 }
0x1033   :  { %v1404_v57 = vpop.permute.xlu1 %1403 }
0x1034   :  { %v1402_v58 = vpop.permute.xlu0 %1401  ;;  %v1408_v62 = vmul.f32 %v1404_v57, %v1398_v59 }
0x1035   :  { %v1407_v2 = vmul.f32 %v1402_v58, %v1397_v60 }
0x1037   :  { %v1412_v61 = vpop.permute.xlu1 %1411 }
0x1038   :  { %v1416_v63 = vmul.f32 %v2255_v45, %v1412_v61  ;;  %v1410_v1 = vpop.permute.xlu0 %1409 }
0x1039   :  { %v1415_v3 = vmul.f32 %v2257_v47, %v1410_v1 }
0x103a   :  { %v1418_v6 = vadd.f32 %v1416_v63, %v1408_v62 }
0x103b   :  { %v1417_v8 = vadd.f32 %v1415_v3, %v1407_v2  ;;  %v2286_v3 = vld [vmem:[%s2722_s3 + $0x8] sm:$0xf] }
0x103c   :  { %1423 = vrot.lane.b32.xlu1 %v1418_v6, %s2293_s9 }
0x103d   :  { %1421 = vrot.lane.b32.xlu0 %v1417_v8, %s2293_s9 }
0x10ae   :  { %v1424_v9 = vpop.permute.xlu1 %1423 }
0x10af   :  { %1428 = vst.msk [vmem:[#allocation2 + $0x8] sm:$0xf] %vm25_vm1, %v1424_v9  ;;  %1956 = vst.msk [vmem:[%s2725_s5 + $0x2a] sm:$0xf] %vm25_vm1, %v1424_v9  ;;  %v1422_v10 = vpop.permute.xlu0 %1421  ;;  %v2287_v9 = vld [vmem:[%s2722_s3] sm:$0xff] }
0x10b0   :  { %1427 = vst.msk [vmem:[#allocation2] sm:$0xff] %vm23_vm0, %v1422_v10 }
0x10b1   :  { %1954 = vst.msk [vmem:[%s2724_s4 + $0x28] sm:$0x3f] %vm264_vm5, %v1422_v10 }
0x10b2   :  { %1955 = vst.msk [vmem:[%s2725_s5 + $0x22] sm:$0xc0] %vm266_vm6, %v1422_v10 }
0x10b6   :  { %v1438_v11 = vld [vmem:[#allocation2 + $0x8] sm:$0xf] }
0x10b7   :  { %v1437_v12 = vld [vmem:[#allocation2] sm:$0xff]  ;;  %v1514_v13 = vrot.slane %v1438_v11, 6 }
0x10b8   :  { %2112 = vmatmul.mubr.msk.f32.vlgmr.msra.gmra.mrb[12].mxu0 %vm23_vm0, %v1437_v12  ;;  %v1513_v14 = vrot.slane %v1437_v12, 6 }
0x10b9   :  { %2179 = vmatpush3.bf16.msra.mxu0 %v2349_v7  ;;  %2125 = vmatprep.mubr.msk.f32.mxu0 %vm2290_vm2, %v2289_v4 }
0x10ba   :  { %v1515_v15 = vsel %vm112_vm3, %v1513_v14, %v1514_v13 }
0x10bb   :  { %2119 = vmatmul.mubr.msk.f32.vlgmr.msra.gmra.mrb[12].mxu1 %vm23_vm0, %v1515_v15 }
0x10bc   :  { %2182 = vmatpush3.bf16.msra.mxu1 %v2338_v5  ;;  %2132 = vmatprep.mubr.msk.f32.mxu1 %vm2290_vm2, %v2289_v4  ;;  %v1958_v5 = vld [vmem:[%s2723_s0 + $0x68] sm:$0xf]  ;;  %v1957_v4 = vld [vmem:[%s2723_s0 + $0x60] sm:$0xff] }
0x118b   :  { %v1508_v16 = vpop.f32.mrb[12].mxu0 }
0x118c   :  { %v2113_v17 = vpop.f32.mrb[13].mxu0 }
0x118e   :  { %v1584_v19 = vpop.f32.mrb[12].mxu1 }
0x118f   :  { %v1589_v20 = vrot.slane %v1584_v19, 2  ;;  %v2120_v22 = vpop.f32.mrb[13].mxu1 }
0x1191   :  { %v1593_v23 = vadd.f32 %v1589_v20, %v2383_v21  ;;  %v1591_v7 = vsel %vm191_vm4, %v1508_v16, %v1589_v20 }
0x1192   :  { %v1592_v24 = vadd.f32 %v1591_v7, %v2376_v18 }
0x1193   :  { %1612 = vrot.lane.b32.xlu1 %v1593_v23, %s2291_s28  ;;  %v1595_v25 = vadd.f32 %v1958_v5, %v1593_v23 }
0x1194   :  { %1610 = vrot.lane.b32.xlu0 %v1592_v24, %s2291_s28  ;;  %v1594_v26 = vadd.f32 %v1957_v4, %v1592_v24 }
0x1195   :  { %v1962_v27 = vmul.f32 -1.442695, %v1595_v25 }
0x1196   :  { %v1961_v21 = vmul.f32 -1.442695, %v1594_v26 }
0x1197   :  { %2262 = vpow2.f32 %v1962_v27 }
0x1198   :  { %2264 = vpow2.f32 %v1961_v21 }
0x11a1   :  { %v2263_v28 = vpop.eup %2262 }
0x11a2   :  { %v2265_v18 = vpop.eup %2264  ;;  %v1603_v29 = vadd.f32 1.0, %v2263_v28 }
0x11a3   :  { %v1602_v30 = vadd.f32 1.0, %v2265_v18 }
0x11a4   :  { %2266 = vrcp.f32 %v1603_v29 }
0x11a5   :  { %2268 = vrcp.f32 %v1602_v30 }
0x11ae   :  { %v2267_v31 = vpop.eup %2266 }
0x11af   :  { %v2269_v33 = vpop.eup %2268  ;;  %v1631_v44 = vsub.f32 1.0, %v2267_v31 }
0x11b0   :  { %v1630_v45 = vsub.f32 1.0, %v2269_v33 }
0x1205   :  { %v1613_v32 = vpop.permute.xlu1 %1612 }
0x1206   :  { %v1617_v34 = vmul.f32 %v2267_v31, %v1613_v32  ;;  %v1611_v35 = vpop.permute.xlu0 %1610 }
0x1207   :  { %v1616_v36 = vmul.f32 %v2269_v33, %v1611_v35 }
0x1208   :  { %1622 = vrot.lane.b32.xlu1 %v1617_v34, %s2292_s8 }
0x1209   :  { %1620 = vrot.lane.b32.xlu0 %v1616_v36, %s2292_s8 }
0x127a   :  { %v1623_v0 = vpop.permute.xlu1 %1622 }
0x127b   :  { %v1627_v37 = vadd.f32 %v1958_v5, %v1623_v0  ;;  %v1621_v38 = vpop.permute.xlu0 %1620 }
0x127c   :  { %v1626_v39 = vadd.f32 %v1957_v4, %v1621_v38 }
0x127d   :  { %2270 = vtanh.f32 %v1627_v37 }
0x127e   :  { %2272 = vtanh.f32 %v1626_v39 }
0x1287   :  { %v2271_v40 = vpop.eup %2270 }
0x1288   :  { %v2273_v41 = vpop.eup %2272  ;;  %1636 = vrot.lane.b32.xlu1 %v2271_v40, %s2293_s9 }
0x1289   :  { %1634 = vrot.lane.b32.xlu0 %v2273_v41, %s2293_s9 }
0x128c   :  { %1644 = vrot.lane.b32.xlu1 %v1438_v11, %s2294_s10  ;;  %v1967_v11 = vld [vmem:[%s2723_s0 + $0x78] sm:$0xf] }
0x128d   :  { %1642 = vrot.lane.b32.xlu0 %v1437_v12, %s2294_s10  ;;  %v1966_v12 = vld [vmem:[%s2723_s0 + $0x70] sm:$0xff] }
0x12fa   :  { %v1637_v42 = vpop.permute.xlu1 %1636 }
0x12fb   :  { %v1635_v43 = vpop.permute.xlu0 %1634  ;;  %v1641_v47 = vmul.f32 %v1637_v42, %v1631_v44 }
0x12fc   :  { %v1640_v50 = vmul.f32 %v1635_v43, %v1630_v45 }
0x12fe   :  { %v1645_v46 = vpop.permute.xlu1 %1644 }
0x12ff   :  { %v1649_v48 = vmul.f32 %v2267_v31, %v1645_v46  ;;  %v1643_v49 = vpop.permute.xlu0 %1642 }
0x1300   :  { %v1648_v51 = vmul.f32 %v2269_v33, %v1643_v49 }
0x1301   :  { %v1651_v52 = vadd.f32 %v1649_v48, %v1641_v47 }
0x1302   :  { %v1650_v53 = vadd.f32 %v1648_v51, %v1640_v50 }
0x1303   :  { %1656 = vrot.lane.b32.xlu1 %v1651_v52, %s2293_s9 }
0x1304   :  { %1654 = vrot.lane.b32.xlu0 %v1650_v53, %s2293_s9 }
0x1375   :  { %v1657_v54 = vpop.permute.xlu1 %1656 }
0x1376   :  { %1661 = vst.msk [vmem:[#allocation2 + $0x8] sm:$0xf] %vm25_vm1, %v1657_v54  ;;  %1965 = vst.msk [vmem:[%s2725_s5 + $0x32] sm:$0xf] %vm25_vm1, %v1657_v54  ;;  %v1655_v55 = vpop.permute.xlu0 %1654 }
0x1377   :  { %1660 = vst.msk [vmem:[#allocation2] sm:$0xff] %vm23_vm0, %v1655_v55 }
0x1378   :  { %1963 = vst.msk [vmem:[%s2724_s4 + $0x30] sm:$0x3f] %vm264_vm5, %v1655_v55 }
0x1379   :  { %1964 = vst.msk [vmem:[%s2725_s5 + $0x2a] sm:$0xc0] %vm266_vm6, %v1655_v55 }
0x137d   :  { %v1671_v56 = vld [vmem:[#allocation2 + $0x8] sm:$0xf] }
0x137e   :  { %v1670_v57 = vld [vmem:[#allocation2] sm:$0xff]  ;;  %v1747_v58 = vrot.slane %v1671_v56, 6 }
0x137f   :  { %2126 = vmatmul.mubr.msk.f32.vlgmr.msra.gmra.mrb[14].mxu0 %vm23_vm0, %v1670_v57  ;;  %v1746_v59 = vrot.slane %v1670_v57, 6 }
0x1381   :  { %v1748_v60 = vsel %vm112_vm3, %v1746_v59, %v1747_v58 }
0x1382   :  { %2133 = vmatmul.mubr.msk.f32.vlgmr.msra.gmra.mrb[14].mxu1 %vm23_vm0, %v1748_v60 }
0x1452   :  { %v1741_v61 = vpop.f32.mrb[14].mxu0 }
0x1453   :  { %v2127_v62 = vpop.f32.mrb[15].mxu0 }
0x1455   :  { %v1817_v63 = vpop.f32.mrb[14].mxu1 }
0x1456   :  { %v1822_v1 = vrot.slane %v1817_v63, 2  ;;  %v2134_v2 = vpop.f32.mrb[15].mxu1 }
0x1458   :  { %v1826_v6 = vadd.f32 %v2286_v3, %v1822_v1  ;;  %v1824_v8 = vsel %vm191_vm4, %v1741_v61, %v1822_v1 }
0x1459   :  { %v1825_v10 = vadd.f32 %v2287_v9, %v1824_v8 }
0x145a   :  { %1845 = vrot.lane.b32.xlu1 %v1826_v6, %s2291_s28  ;;  %v1828_v13 = vadd.f32 %v1967_v11, %v1826_v6 }
0x145b   :  { %1843 = vrot.lane.b32.xlu0 %v1825_v10, %s2291_s28  ;;  %v1827_v14 = vadd.f32 %v1966_v12, %v1825_v10 }
0x145c   :  { %v1971_v15 = vmul.f32 -1.442695, %v1828_v13 }
0x145d   :  { %v1970_v16 = vmul.f32 -1.442695, %v1827_v14 }
0x145e   :  { %2274 = vpow2.f32 %v1971_v15 }
0x145f   :  { %2276 = vpow2.f32 %v1970_v16 }
0x1468   :  { %v2275_v17 = vpop.eup %2274 }
0x1469   :  { %v2277_v19 = vpop.eup %2276  ;;  %v1836_v20 = vadd.f32 1.0, %v2275_v17 }
0x146a   :  { %v1835_v22 = vadd.f32 1.0, %v2277_v19 }
0x146b   :  { %2278 = vrcp.f32 %v1836_v20 }
0x146c   :  { %2280 = vrcp.f32 %v1835_v22 }
0x1475   :  { %v2279_v23 = vpop.eup %2278 }
0x1476   :  { %v2281_v24 = vpop.eup %2280  ;;  %v1864_v32 = vsub.f32 1.0, %v2279_v23 }
0x1477   :  { %v1863_v33 = vsub.f32 1.0, %v2281_v24 }
0x14cc   :  { %v1846_v7 = vpop.permute.xlu1 %1845 }
0x14cd   :  { %v1850_v5 = vmul.f32 %v2279_v23, %v1846_v7  ;;  %v1844_v4 = vpop.permute.xlu0 %1843 }
0x14ce   :  { %v1849_v25 = vmul.f32 %v2281_v24, %v1844_v4 }
0x14cf   :  { %1855 = vrot.lane.b32.xlu1 %v1850_v5, %s2292_s8 }
0x14d0   :  { %1853 = vrot.lane.b32.xlu0 %v1849_v25, %s2292_s8 }
0x1541   :  { %v1856_v26 = vpop.permute.xlu1 %1855 }
0x1542   :  { %v1860_v27 = vadd.f32 %v1967_v11, %v1856_v26  ;;  %v1854_v21 = vpop.permute.xlu0 %1853 }
0x1543   :  { %v1859_v28 = vadd.f32 %v1966_v12, %v1854_v21 }
0x1544   :  { %2282 = vtanh.f32 %v1860_v27 }
0x1545   :  { %2284 = vtanh.f32 %v1859_v28 }
0x154e   :  { %v2283_v18 = vpop.eup %2282 }
0x154f   :  { %v2285_v29 = vpop.eup %2284  ;;  %1869 = vrot.lane.b32.xlu1 %v2283_v18, %s2293_s9 }
0x1550   :  { %1867 = vrot.lane.b32.xlu0 %v2285_v29, %s2293_s9 }
0x1553   :  { %1877 = vrot.lane.b32.xlu1 %v1671_v56, %s2294_s10 }
0x1554   :  { %1875 = vrot.lane.b32.xlu0 %v1670_v57, %s2294_s10 }
0x15c1   :  { %v1870_v30 = vpop.permute.xlu1 %1869 }
0x15c2   :  { %v1868_v31 = vpop.permute.xlu0 %1867  ;;  %v1874_v35 = vmul.f32 %v1870_v30, %v1864_v32 }
0x15c3   :  { %v1873_v37 = vmul.f32 %v1868_v31, %v1863_v33 }
0x15c5   :  { %v1878_v34 = vpop.permute.xlu1 %1877 }
0x15c6   :  { %v1882_v36 = vmul.f32 %v2279_v23, %v1878_v34  ;;  %v1876_v0 = vpop.permute.xlu0 %1875 }
0x15c7   :  { %v1881_v38 = vmul.f32 %v2281_v24, %v1876_v0 }
0x15c8   :  { %v1884_v39 = vadd.f32 %v1882_v36, %v1874_v35 }
0x15c9   :  { %v1883_v40 = vadd.f32 %v1881_v38, %v1873_v37 }
0x15ca   :  { %1889 = vrot.lane.b32.xlu1 %v1884_v39, %s2293_s9 }
0x15cb   :  { %1887 = vrot.lane.b32.xlu0 %v1883_v40, %s2293_s9 }
0x163c   :  { %v1890_v41 = vpop.permute.xlu1 %1889 }
0x163d   :  { %1894 = vst.msk [vmem:[#allocation2 + $0x8] sm:$0xf] %vm25_vm1, %v1890_v41  ;;  %1974 = vst.msk [vmem:[%s2725_s5 + $0x3a] sm:$0xf] %vm25_vm1, %v1890_v41  ;;  %v1888_v42 = vpop.permute.xlu0 %1887 }
0x163e   :  { %1893 = vst.msk [vmem:[#allocation2] sm:$0xff] %vm23_vm0, %v1888_v42 }
0x163f   :  { %1972 = vst.msk [vmem:[%s2724_s4 + $0x38] sm:$0x3f] %vm264_vm5, %v1888_v42 }
0x1640   :  { %1973 = vst.msk [vmem:[%s2725_s5 + $0x32] sm:$0xc0] %vm266_vm6, %v1888_v42 }

</bundles_post_ra>
